<compile_context>
chip_gen: v6e
topology: v6e:2x2x1
jax: 0.10.0
libtpu: 0.0.40
codegen_flags: <defaults>
</compile_context>

<pallas_src>
import math
import functools

import jax
import jax.numpy as jnp
from jax.experimental import pallas as pl
from jax.experimental.pallas import tpu as pltpu


# Tiling targets (shrunk / padded automatically for small or ragged dims).
_TM = 256          # rows (M = B*S) per tile    -- sublane axis, multiple of 8
_TN = 256          # output features per tile   -- lane axis,    multiple of 128
_TK = 512          # contraction slice per tile -- lane axis,    multiple of 128
_TQ = 256          # attention query-tile rows
_TKV = 256         # attention key/value-tile rows
_VMEM_LIMIT = 32 * 1024 * 1024


def _pick_tile(dim, target, align):
    """Largest tile <= target that divides dim and is align-aligned.
    Returns dim itself if dim <= target (full-dim block is always legal),
    or None if no aligned divisor exists (caller should pad)."""
    if dim <= target:
        return dim
    t = (target // align) * align
    while t >= align:
        if dim % t == 0:
            return t
        t -= align
    return None


def _dim_and_tile(dim, target, align):
    """Return (possibly padded dim, tile size)."""
    t = _pick_tile(dim, target, align)
    if t is not None:
        return dim, t
    padded = ((dim + align - 1) // align) * align
    return padded, _pick_tile(padded, target, align)


def _gelu_exact(y):
    # exact erf-GELU == torch.nn.functional.gelu default (f32 math)
    return 0.5 * y * (1.0 + jax.lax.erf(y * (1.0 / math.sqrt(2.0))))


# ------------------------- LayerNorm + matmul kernel -------------------------

def _ln_matmul_kernel(x_ref, g_ref, b_ref, w_ref, *rest, activation, has_bias):
    """o = act(LayerNorm(x) @ w [+ bias]); LN cached across N-tiles."""
    if has_bias:
        bias_ref, o_ref, xn_ref = rest
    else:
        o_ref, xn_ref = rest

    @pl.when(pl.program_id(1) == 0)
    def _():
        x = x_ref[...].astype(jnp.float32)
        mean = jnp.mean(x, axis=-1, keepdims=True)
        var = jnp.mean(jnp.square(x - mean), axis=-1, keepdims=True)  # biased
        xn = (x - mean) * jax.lax.rsqrt(var + 1e-5)
        xn = xn * g_ref[...].astype(jnp.float32) + b_ref[...].astype(jnp.float32)
        xn_ref[...] = xn.astype(xn_ref.dtype)          # bf16 cache for the MXU

    y = jnp.dot(xn_ref[...], w_ref[...], preferred_element_type=jnp.float32)
    if has_bias:
        y = y + bias_ref[...].astype(jnp.float32)
    if activation == "gelu":
        y = _gelu_exact(y)
    o_ref[...] = y.astype(o_ref.dtype)


def ln_linear(x2d, gamma, beta, w, bias=None, activation=None,
              tm_target=_TM, tn_target=_TN):
    """act(LayerNorm(x2d) @ w + bias), tiled over (M, N); LN fused + cached."""
    M, K = x2d.shape
    K2, N = w.shape
    assert K == K2
    Mp, tm = _dim_and_tile(M, tm_target, 8)
    Np, tn = _dim_and_tile(N, tn_target, 128)
    has_bias = bias is not None

    if Mp != M:
        x2d = jnp.pad(x2d, ((0, Mp - M), (0, 0)))
    if Np != N:
        w = jnp.pad(w, ((0, 0), (0, Np - N)))
        if has_bias:
            bias = jnp.pad(bias, ((0, Np - N),))

    in_specs = [
        pl.BlockSpec((tm, K), lambda i, j: (i, 0)),
        pl.BlockSpec((1, K), lambda i, j: (0, 0)),
        pl.BlockSpec((1, K), lambda i, j: (0, 0)),
        pl.BlockSpec((K, tn), lambda i, j: (0, j)),
    ]
    args = [x2d, gamma.reshape(1, K), beta.reshape(1, K), w]
    if has_bias:
        in_specs.append(pl.BlockSpec((1, tn), lambda i, j: (0, j)))
        args.append(bias.reshape(1, Np))

    kernel = functools.partial(_ln_matmul_kernel, activation=activation,
                               has_bias=has_bias)
    out = pl.pallas_call(
        kernel,
        out_shape=jax.ShapeDtypeStruct((Mp, Np), x2d.dtype),
        grid_spec=pltpu.PrefetchScalarGridSpec(
            num_scalar_prefetch=0,
            grid=(Mp // tm, Np // tn),
            in_specs=in_specs,
            out_specs=pl.BlockSpec((tm, tn), lambda i, j: (i, j)),
            scratch_shapes=[pltpu.VMEM((tm, K), w.dtype)],   # LN cache
        ),
        compiler_params=pltpu.CompilerParams(
            dimension_semantics=("parallel", "arbitrary"),   # j sequential (cache)
            vmem_limit_bytes=_VMEM_LIMIT),
    )(*args)
    if Mp != M or Np != N:
        out = out[:M, :N]
    return out


# ------------------------- K-tiled matmul (+ epilogue) ------------------------

def _matmul_kernel(*refs, activation, has_bias, has_residual):
    refs = list(refs)
    x_ref = refs.pop(0)
    w_ref = refs.pop(0)
    bias_ref = refs.pop(0) if has_bias else None
    res_ref = refs.pop(0) if has_residual else None
    o_ref = refs.pop(0)
    acc_ref = refs.pop(0)

    @pl.when(pl.program_id(2) == 0)
    def _():
        acc_ref[...] = jnp.zeros_like(acc_ref)

    # bf16 operands straight into the MXU, f32 accumulation.
    acc_ref[...] += jnp.dot(x_ref[...], w_ref[...],
                            preferred_element_type=jnp.float32)

    @pl.when(pl.program_id(2) == pl.num_programs(2) - 1)
    def _():
        y = acc_ref[...]
        if has_bias:
            y = y + bias_ref[...].astype(jnp.float32)
        if activation == "gelu":
            y = _gelu_exact(y)
        if has_residual:
            y = y + res_ref[...].astype(jnp.float32)
        o_ref[...] = y.astype(o_ref.dtype)


def linear(x2d, w, bias=None, residual=None, activation=None,
           tm_target=_TM, tn_target=_TN, tk_target=_TK):
    """act(x2d @ w + bias) [+ residual], tiled (M, N, K), f32 VMEM accumulator."""
    M, K = x2d.shape
    K2, N = w.shape
    assert K == K2
    Mp, tm = _dim_and_tile(M, tm_target, 8)
    Np, tn = _dim_and_tile(N, tn_target, 128)
    tk = _pick_tile(K, tk_target, 128)
    if tk is None:
        tk = K  # TODO(synk): ragged K falls back to a full-K block (fine at E/4E)
    has_bias = bias is not None
    has_residual = residual is not None

    if Mp != M:
        x2d = jnp.pad(x2d, ((0, Mp - M), (0, 0)))
        if has_residual:
            residual = jnp.pad(residual, ((0, Mp - M), (0, 0)))
    if Np != N:
        w = jnp.pad(w, ((0, 0), (0, Np - N)))
        if has_bias:
            bias = jnp.pad(bias, ((0, Np - N),))
        if has_residual:
            residual = jnp.pad(residual, ((0, 0), (0, Np - N)))

    in_specs = [
        pl.BlockSpec((tm, tk), lambda i, j, k: (i, k)),
        pl.BlockSpec((tk, tn), lambda i, j, k: (k, j)),
    ]
    args = [x2d, w]
    if has_bias:
        in_specs.append(pl.BlockSpec((1, tn), lambda i, j, k: (0, j)))
        args.append(bias.reshape(1, Np))
    if has_residual:
        in_specs.append(pl.BlockSpec((tm, tn), lambda i, j, k: (i, j)))
        args.append(residual)

    kernel = functools.partial(_matmul_kernel, activation=activation,
                               has_bias=has_bias, has_residual=has_residual)
    out = pl.pallas_call(
        kernel,
        out_shape=jax.ShapeDtypeStruct((Mp, Np), x2d.dtype),
        grid_spec=pltpu.PrefetchScalarGridSpec(
            num_scalar_prefetch=0,
            grid=(Mp // tm, Np // tn, K // tk),
            in_specs=in_specs,
            out_specs=pl.BlockSpec((tm, tn), lambda i, j, k: (i, j)),
            scratch_shapes=[pltpu.VMEM((tm, tn), jnp.float32)],
        ),
        compiler_params=pltpu.CompilerParams(
            dimension_semantics=("parallel", "parallel", "arbitrary"),
            vmem_limit_bytes=_VMEM_LIMIT),
    )(*args)
    if Mp != M or Np != N:
        out = out[:M, :N]
    return out


# -------------------------- flash attention kernel ---------------------------

def _flash_attn_kernel(q_ref, k_ref, v_ref, o_ref, m_sc, l_sc, acc_sc):
    tq = q_ref.shape[1]
    tk = k_ref.shape[1]
    qi = pl.program_id(1)
    ki = pl.program_id(2)

    @pl.when(ki == 0)
    def _():
        m_sc[...] = jnp.full(m_sc.shape, -1e30, m_sc.dtype)
        l_sc[...] = jnp.zeros(l_sc.shape, l_sc.dtype)
        acc_sc[...] = jnp.zeros(acc_sc.shape, acc_sc.dtype)

    # Skip KV tiles entirely in the causal future of this Q tile.
    @pl.when(ki * tk <= qi * tq + (tq - 1))
    def _():
        q = q_ref[0]                                    # (tq, D) bf16, pre-scaled
        k = k_ref[0]                                    # (tk, D) bf16
        v = v_ref[0]                                    # (tk, D) bf16
        # contract on D directly (no K transpose), bf16 MXU, f32 scores
        s = jax.lax.dot_general(q, k, (((1,), (1,)), ((), ())),
                                preferred_element_type=jnp.float32)  # (tq, tk)
        row = qi * tq + jax.lax.broadcasted_iota(jnp.int32, (tq, tk), 0)
        col = ki * tk + jax.lax.broadcasted_iota(jnp.int32, (tq, tk), 1)
        s = jnp.where(col <= row, s, -1e30)
        m_prev = m_sc[...]
        m_new = jnp.maximum(m_prev, jnp.max(s, axis=-1, keepdims=True))
        alpha = jnp.exp(m_prev - m_new)
        p = jnp.exp(s - m_new)
        l_sc[...] = alpha * l_sc[...] + jnp.sum(p, axis=-1, keepdims=True)
        acc_sc[...] = alpha * acc_sc[...] + jnp.dot(
            p.astype(v.dtype), v, preferred_element_type=jnp.float32)
        m_sc[...] = m_new

    @pl.when(ki == pl.num_programs(2) - 1)
    def _():
        o_ref[0] = (acc_sc[...] *
                    pl.reciprocal(l_sc[...], approx=True)).astype(o_ref.dtype)


def flash_attention(q, k, v, *, tq_target=_TQ, tk_target=_TKV):
    """q, k, v: (B*H, S, D), q pre-scaled by 1/sqrt(D). Returns (B*H, S, D)."""
    BH, S, D = q.shape
    tq = _pick_tile(S, tq_target, 8) or S
    tk = _pick_tile(S, tk_target, 8) or S
    # TODO(synk): attention-weight dropout omitted (identity / eval semantics)
    return pl.pallas_call(
        _flash_attn_kernel,
        out_shape=jax.ShapeDtypeStruct((BH, S, D), q.dtype),
        grid_spec=pltpu.PrefetchScalarGridSpec(
            num_scalar_prefetch=0,
            grid=(BH, S // tq, S // tk),
            in_specs=[
                pl.BlockSpec((1, tq, D), lambda b, qi, ki: (b, qi, 0)),
                pl.BlockSpec((1, tk, D), lambda b, qi, ki: (b, ki, 0)),
                pl.BlockSpec((1, tk, D), lambda b, qi, ki: (b, ki, 0)),
            ],
            out_specs=pl.BlockSpec((1, tq, D), lambda b, qi, ki: (b, qi, 0)),
            scratch_shapes=[
                pltpu.VMEM((tq, 1), jnp.float32),   # running max
                pltpu.VMEM((tq, 1), jnp.float32),   # running sum
                pltpu.VMEM((tq, D), jnp.float32),   # output accumulator
            ],
        ),
        compiler_params=pltpu.CompilerParams(
            dimension_semantics=("parallel", "parallel", "arbitrary"),
            vmem_limit_bytes=_VMEM_LIMIT),
    )(q, k, v)


# ----------------------------- model (glue) ----------------------------------

def transformer_block(p, h2d, B, S, num_heads):
    E = h2d.shape[1]
    D = E // num_heads
    # LN1 + fused QKV projection (single lane-dense (E, 3E) matmul)
    qkv = ln_linear(h2d, p["ln1_g"], p["ln1_b"], p["w_qkv"], p["b_qkv"])  # (M, 3E)
    # head split (XLA glue): (M, 3E) -> (3, B*H, S, D)
    qkv = qkv.reshape(B, S, 3, num_heads, D).transpose(2, 0, 3, 1, 4)
    qkv = qkv.reshape(3, B * num_heads, S, D)
    scale = jnp.asarray(1.0 / math.sqrt(D), dtype=qkv.dtype)
    attn = flash_attention(qkv[0] * scale, qkv[1], qkv[2])               # (BH,S,D)
    # head merge (XLA glue): (B*H, S, D) -> (B*S, E)
    attn = attn.reshape(B, num_heads, S, D).transpose(0, 2, 1, 3).reshape(B * S, E)
    # output projection with the residual add fused into the epilogue
    h2d = linear(attn, p["wo"], p["bo"], residual=h2d)
    # LN2 + FF1 (+ GELU) fused; FF2 with residual fused
    ff = ln_linear(h2d, p["ln2_g"], p["ln2_b"], p["w1"], p["b1"], activation="gelu")
    h2d = linear(ff, p["w2"], p["b2"], residual=h2d)
    return h2d


def make_gpt2_forward(num_heads):
    def forward(params, input_ids):
        B, S = input_ids.shape
        E = params["wte"].shape[1]

        # embeddings (gather + add is glue, not a hot path)
        tok = jnp.take(params["wte"], input_ids, axis=0)        # (B, S, E) bf16
        pos = jnp.take(params["wpe"], jnp.arange(S), axis=0)    # (S, E)    bf16
        h2d = (tok + pos[None, :, :]).reshape(B * S, E)
        # TODO(synk): embedding dropout omitted (identity / eval-mode semantics)

        for blk in params["blocks"]:
            h2d = transformer_block(blk, h2d, B, S, num_heads)

        # final LayerNorm fused into the bias-free lm-head matmul; big row tile
        # so the (E, vocab) bf16 weight is streamed fewer times.
        vocab = params["head_w"].shape[1]
        logits = ln_linear(h2d, params["ln_f_g"], params["ln_f_b"],
                           params["head_w"], bias=None,
                           tm_target=512, tn_target=256)
        return logits.reshape(B, S, vocab)

    return forward


# ----------------------------- param init ------------------------------------

def init_params(key, vocab_size, embedding_size, num_layers, max_pos,
                dtype=jnp.bfloat16):
    def nrm(k, shape, std=0.02):
        return (std * jax.random.normal(k, shape)).astype(dtype)

    E = embedding_size
    keys = iter(jax.random.split(key, 8 + 16 * num_layers))
    params = {
        "wte": nrm(next(keys), (vocab_size, E)),
        "wpe": nrm(next(keys), (max_pos, E)),
        "ln_f_g": jnp.ones((E,), jnp.float32),
        "ln_f_b": jnp.zeros((E,), jnp.float32),
        "head_w": nrm(next(keys), (E, vocab_size)),
        "blocks": [],
    }
    for _ in range(num_layers):
        wq = nrm(next(keys), (E, E))
        wk = nrm(next(keys), (E, E))
        wv = nrm(next(keys), (E, E))
        blk = {
            "ln1_g": jnp.ones((E,), jnp.float32),
            "ln1_b": jnp.zeros((E,), jnp.float32),
            "w_qkv": jnp.concatenate([wq, wk, wv], axis=1),      # (E, 3E) fused
            "b_qkv": jnp.zeros((3 * E,), dtype),
            "wo": nrm(next(keys), (E, E)), "bo": jnp.zeros((E,), dtype),
            "ln2_g": jnp.ones((E,), jnp.float32),
            "ln2_b": jnp.zeros((E,), jnp.float32),
            "w1": nrm(next(keys), (E, 4 * E)), "b1": jnp.zeros((4 * E,), dtype),
            "w2": nrm(next(keys), (4 * E, E)), "b2": jnp.zeros((E,), dtype),
        }
        params["blocks"].append(blk)
    return params


# ----------------------------- main -------------------------------------------

if __name__ == "__main__":
    vocab_size = 256
    embedding_size = 64
    num_layers = 2
    num_heads = 4
    max_position_embeddings = 32
    batch, seq = 2, 16

    key = jax.random.PRNGKey(0)
    pkey, dkey = jax.random.split(key)
    params = init_params(pkey, vocab_size, embedding_size, num_layers,
                         max_position_embeddings)
    input_ids = jax.random.randint(dkey, (batch, seq), 0, vocab_size,
                                   dtype=jnp.int32)

    forward = jax.jit(make_gpt2_forward(num_heads))
    logits = forward(params, input_ids)
    jax.block_until_ready(logits)

    assert logits.shape == (batch, seq, vocab_size)
    assert bool(jnp.all(jnp.isfinite(logits.astype(jnp.float32))))
    print("KERNEL_OK")
</pallas_src>

<mosaic_0001>
module attributes {stable_mosaic.version = 11 : i64} {
  func.func @_ln_matmul_kernel(%arg0: i32, %arg1: i32, %arg2: memref<32x64xbf16, #tpu.memory_space<vmem>>, %arg3: memref<1x64xf32, #tpu.memory_space<vmem>>, %arg4: memref<1x64xf32, #tpu.memory_space<vmem>>, %arg5: memref<64x192xbf16, #tpu.memory_space<vmem>>, %arg6: memref<1x192xbf16, #tpu.memory_space<vmem>>, %arg7: memref<32x192xbf16, #tpu.memory_space<vmem>>, %arg8: memref<32x64xbf16, #tpu.memory_space<vmem>>) attributes {dimension_semantics = [#tpu.dimension_semantics<parallel>, #tpu.dimension_semantics<arbitrary>], iteration_bounds = array<i64: 1, 1>, scalar_prefetch = 0 : i64, scratch_operands = 1 : i64, tpu.core_type = #tpu.core_type<tc>, window_params = [{transform_indices = @transform_0, window_bounds = array<i64: 32, 64>}, {pipeline_mode = #tpu.pipeline_mode<synchronous>, transform_indices = @transform_1, window_bounds = array<i64: 1, 64>}, {pipeline_mode = #tpu.pipeline_mode<synchronous>, transform_indices = @transform_2, window_bounds = array<i64: 1, 64>}, {transform_indices = @transform_3, window_bounds = array<i64: 64, 192>}, {transform_indices = @transform_4, window_bounds = array<i64: 1, 192>}, {transform_indices = @transform_5, window_bounds = array<i64: 32, 192>}]} {
    %c0_i32 = arith.constant 0 : i32
    %0 = arith.cmpi eq, %arg1, %c0_i32 : i32
    %1 = arith.extui %0 : i1 to i32
    %c0_i32_0 = arith.constant 0 : i32
    %2 = arith.cmpi ne, %1, %c0_i32_0 : i32
    scf.if %2 {
      %c0_8 = arith.constant 0 : index
      %c0_9 = arith.constant 0 : index
      %12 = vector.load %arg2[%c0_8, %c0_9] : memref<32x64xbf16, #tpu.memory_space<vmem>>, vector<32x64xbf16>
      %13 = arith.extf %12 : vector<32x64xbf16> to vector<32x64xf32>
      %cst_10 = arith.constant dense<0.000000e+00> : vector<32xf32>
      %14 = vector.multi_reduction <add>, %13, %cst_10 [1] : vector<32x64xf32> to vector<32xf32>
      %15 = vector.shape_cast %14 : vector<32xf32> to vector<32x1xf32>
      %cst_11 = arith.constant 6.400000e+01 : f32
      %16 = vector.broadcast %cst_11 : f32 to vector<32x1xf32>
      %17 = arith.divf %15, %16 : vector<32x1xf32>
      %18 = vector.broadcast %17 : vector<32x1xf32> to vector<32x64xf32>
      %19 = arith.subf %13, %18 : vector<32x64xf32>
      %20 = arith.mulf %19, %19 : vector<32x64xf32>
      %cst_12 = arith.constant dense<0.000000e+00> : vector<32xf32>
      %21 = vector.multi_reduction <add>, %20, %cst_12 [1] : vector<32x64xf32> to vector<32xf32>
      %22 = vector.shape_cast %21 : vector<32xf32> to vector<32x1xf32>
      %cst_13 = arith.constant 6.400000e+01 : f32
      %23 = vector.broadcast %cst_13 : f32 to vector<32x1xf32>
      %24 = arith.divf %22, %23 : vector<32x1xf32>
      %25 = vector.broadcast %17 : vector<32x1xf32> to vector<32x64xf32>
      %26 = arith.subf %13, %25 : vector<32x64xf32>
      %cst_14 = arith.constant 9.99999974E-6 : f32
      %27 = vector.broadcast %cst_14 : f32 to vector<32x1xf32>
      %28 = arith.addf %24, %27 : vector<32x1xf32>
      %29 = math.rsqrt %28 : vector<32x1xf32>
      %30 = vector.broadcast %29 : vector<32x1xf32> to vector<32x64xf32>
      %31 = arith.mulf %26, %30 : vector<32x64xf32>
      %c0_15 = arith.constant 0 : index
      %c0_16 = arith.constant 0 : index
      %32 = vector.load %arg3[%c0_15, %c0_16] : memref<1x64xf32, #tpu.memory_space<vmem>>, vector<1x64xf32>
      %33 = vector.broadcast %32 : vector<1x64xf32> to vector<32x64xf32>
      %34 = arith.mulf %31, %33 : vector<32x64xf32>
      %c0_17 = arith.constant 0 : index
      %c0_18 = arith.constant 0 : index
      %35 = vector.load %arg4[%c0_17, %c0_18] : memref<1x64xf32, #tpu.memory_space<vmem>>, vector<1x64xf32>
      %36 = vector.broadcast %35 : vector<1x64xf32> to vector<32x64xf32>
      %37 = arith.addf %34, %36 : vector<32x64xf32>
      %38 = arith.truncf %37 : vector<32x64xf32> to vector<32x64xbf16>
      %c0_19 = arith.constant 0 : index
      %c0_20 = arith.constant 0 : index
      %39 = vector.load %arg8[%c0_19, %c0_20] : memref<32x64xbf16, #tpu.memory_space<vmem>>, vector<32x64xbf16>
      tpu.vector_store %arg8[%c0_19, %c0_20], %38 {strides = array<i32>} : memref<32x64xbf16, #tpu.memory_space<vmem>>, vector<32x64xbf16>,
    } else {
    }
    %c0 = arith.constant 0 : index
    %c0_1 = arith.constant 0 : index
    %3 = vector.load %arg8[%c0, %c0_1] : memref<32x64xbf16, #tpu.memory_space<vmem>>, vector<32x64xbf16>
    %c0_2 = arith.constant 0 : index
    %c0_3 = arith.constant 0 : index
    %4 = vector.load %arg5[%c0_2, %c0_3] : memref<64x192xbf16, #tpu.memory_space<vmem>>, vector<64x192xbf16>
    %cst = arith.constant dense<0.000000e+00> : vector<32x192xf32>
    %5 = tpu.matmul %3, %4, %cst {dimension_numbers = #tpu.dot_dimension_numbers<[1], [0], [0], [1], [0, 0, 1, 1], [], []>} : vector<32x64xbf16>, vector<64x192xbf16>, vector<32x192xf32> -> vector<32x192xf32>
    %c0_4 = arith.constant 0 : index
    %c0_5 = arith.constant 0 : index
    %6 = vector.load %arg6[%c0_4, %c0_5] : memref<1x192xbf16, #tpu.memory_space<vmem>>, vector<1x192xbf16>
    %7 = arith.extf %6 : vector<1x192xbf16> to vector<1x192xf32>
    %8 = vector.broadcast %7 : vector<1x192xf32> to vector<32x192xf32>
    %9 = arith.addf %5, %8 : vector<32x192xf32>
    %10 = arith.truncf %9 : vector<32x192xf32> to vector<32x192xbf16>
    %c0_6 = arith.constant 0 : index
    %c0_7 = arith.constant 0 : index
    %11 = vector.load %arg7[%c0_6, %c0_7] : memref<32x192xbf16, #tpu.memory_space<vmem>>, vector<32x192xbf16>
    tpu.vector_store %arg7[%c0_6, %c0_7], %10 {strides = array<i32>} : memref<32x192xbf16, #tpu.memory_space<vmem>>, vector<32x192xbf16>,
    return
  }
  func.func @transform_0(%arg0: i32, %arg1: i32) -> (i32, i32) {
    %c0_i32 = arith.constant 0 : i32
    %c0_i32_0 = arith.constant 0 : i32
    return %arg0, %c0_i32 : i32, i32
  }
  func.func @transform_1(%arg0: i32, %arg1: i32) -> (i32, i32) {
    %c0_i32 = arith.constant 0 : i32
    %c0_i32_0 = arith.constant 0 : i32
    %c0_i32_1 = arith.constant 0 : i32
    return %c0_i32, %c0_i32_0 : i32, i32
  }
  func.func @transform_2(%arg0: i32, %arg1: i32) -> (i32, i32) {
    %c0_i32 = arith.constant 0 : i32
    %c0_i32_0 = arith.constant 0 : i32
    %c0_i32_1 = arith.constant 0 : i32
    return %c0_i32, %c0_i32_0 : i32, i32
  }
  func.func @transform_3(%arg0: i32, %arg1: i32) -> (i32, i32) {
    %c0_i32 = arith.constant 0 : i32
    %c0_i32_0 = arith.constant 0 : i32
    return %c0_i32, %arg1 : i32, i32
  }
  func.func @transform_4(%arg0: i32, %arg1: i32) -> (i32, i32) {
    %c0_i32 = arith.constant 0 : i32
    %c0_i32_0 = arith.constant 0 : i32
    return %c0_i32, %arg1 : i32, i32
  }
  func.func @transform_5(%arg0: i32, %arg1: i32) -> (i32, i32) {
    %c0_i32 = arith.constant 0 : i32
    return %arg0, %arg1 : i32, i32
  }
}

module attributes {stable_mosaic.version = 11 : i64} {
  func.func @_flash_attn_kernel(%arg0: i32, %arg1: i32, %arg2: i32, %arg3: memref<1x16x16xbf16, #tpu.memory_space<vmem>>, %arg4: memref<1x16x16xbf16, #tpu.memory_space<vmem>>, %arg5: memref<1x16x16xbf16, #tpu.memory_space<vmem>>, %arg6: memref<1x16x16xbf16, #tpu.memory_space<vmem>>, %arg7: memref<16x1xf32, #tpu.memory_space<vmem>>, %arg8: memref<16x1xf32, #tpu.memory_space<vmem>>, %arg9: memref<16x16xf32, #tpu.memory_space<vmem>>) attributes {dimension_semantics = [#tpu.dimension_semantics<parallel>, #tpu.dimension_semantics<parallel>, #tpu.dimension_semantics<arbitrary>], iteration_bounds = array<i64: 8, 1, 1>, scalar_prefetch = 0 : i64, scratch_operands = 3 : i64, tpu.core_type = #tpu.core_type<tc>, window_params = [{transform_indices = @transform_0, window_bounds = array<i64: 1, 16, 16>}, {transform_indices = @transform_1, window_bounds = array<i64: 1, 16, 16>}, {transform_indices = @transform_2, window_bounds = array<i64: 1, 16, 16>}, {transform_indices = @transform_3, window_bounds = array<i64: 1, 16, 16>}]} {
    %c0_i32 = arith.constant 0 : i32
    %0 = arith.cmpi eq, %arg2, %c0_i32 : i32
    %1 = arith.extui %0 : i1 to i32
    %c0_i32_0 = arith.constant 0 : i32
    %2 = arith.cmpi ne, %1, %c0_i32_0 : i32
    scf.if %2 {
      %cst = arith.constant -1.000000e+30 : f32
      %12 = vector.broadcast %cst : f32 to vector<16x1xf32>
      %c0 = arith.constant 0 : index
      %c0_5 = arith.constant 0 : index
      %13 = vector.load %arg7[%c0, %c0_5] : memref<16x1xf32, #tpu.memory_space<vmem>>, vector<16x1xf32>
      tpu.vector_store %arg7[%c0, %c0_5], %12 {strides = array<i32>} : memref<16x1xf32, #tpu.memory_space<vmem>>, vector<16x1xf32>,
      %cst_6 = arith.constant 0.000000e+00 : f32
      %14 = vector.broadcast %cst_6 : f32 to vector<16x1xf32>
      %c0_7 = arith.constant 0 : index
      %c0_8 = arith.constant 0 : index
      %15 = vector.load %arg8[%c0_7, %c0_8] : memref<16x1xf32, #tpu.memory_space<vmem>>, vector<16x1xf32>
      tpu.vector_store %arg8[%c0_7, %c0_8], %14 {strides = array<i32>} : memref<16x1xf32, #tpu.memory_space<vmem>>, vector<16x1xf32>,
      %cst_9 = arith.constant 0.000000e+00 : f32
      %16 = vector.broadcast %cst_9 : f32 to vector<16x16xf32>
      %c0_10 = arith.constant 0 : index
      %c0_11 = arith.constant 0 : index
      %17 = vector.load %arg9[%c0_10, %c0_11] : memref<16x16xf32, #tpu.memory_space<vmem>>, vector<16x16xf32>
      tpu.vector_store %arg9[%c0_10, %c0_11], %16 {strides = array<i32>} : memref<16x16xf32, #tpu.memory_space<vmem>>, vector<16x16xf32>,
    } else {
    }
    %c16_i32 = arith.constant 16 : i32
    %3 = arith.muli %arg2, %c16_i32 : i32
    %c16_i32_1 = arith.constant 16 : i32
    %4 = arith.muli %arg1, %c16_i32_1 : i32
    %c15_i32 = arith.constant 15 : i32
    %5 = arith.addi %4, %c15_i32 : i32
    %6 = arith.cmpi sle, %3, %5 : i32
    %7 = arith.extui %6 : i1 to i32
    %c0_i32_2 = arith.constant 0 : i32
    %8 = arith.cmpi ne, %7, %c0_i32_2 : i32
    scf.if %8 {
      %c0 = arith.constant 0 : index
      %c0_5 = arith.constant 0 : index
      %c0_6 = arith.constant 0 : index
      %12 = vector.load %arg3[%c0, %c0_5, %c0_6] : memref<1x16x16xbf16, #tpu.memory_space<vmem>>, vector<1x16x16xbf16>
      %13 = vector.shape_cast %12 : vector<1x16x16xbf16> to vector<16x16xbf16>
      %c0_7 = arith.constant 0 : index
      %c0_8 = arith.constant 0 : index
      %c0_9 = arith.constant 0 : index
      %14 = vector.load %arg4[%c0_7, %c0_8, %c0_9] : memref<1x16x16xbf16, #tpu.memory_space<vmem>>, vector<1x16x16xbf16>
      %15 = vector.shape_cast %14 : vector<1x16x16xbf16> to vector<16x16xbf16>
      %c0_10 = arith.constant 0 : index
      %c0_11 = arith.constant 0 : index
      %c0_12 = arith.constant 0 : index
      %16 = vector.load %arg5[%c0_10, %c0_11, %c0_12] : memref<1x16x16xbf16, #tpu.memory_space<vmem>>, vector<1x16x16xbf16>
      %17 = vector.shape_cast %16 : vector<1x16x16xbf16> to vector<16x16xbf16>
      %cst = arith.constant dense<0.000000e+00> : vector<16x16xf32>
      %18 = tpu.matmul %13, %15, %cst {dimension_numbers = #tpu.dot_dimension_numbers<[1], [1], [0], [0], [0, 0, 1, 0], [], []>} : vector<16x16xbf16>, vector<16x16xbf16>, vector<16x16xf32> -> vector<16x16xf32>
      %c16_i32_13 = arith.constant 16 : i32
      %19 = arith.muli %arg1, %c16_i32_13 : i32
      %20 = tpu.iota {dimensions = array<i32: 0>} : vector<16x16xi32>
      %21 = vector.broadcast %19 : i32 to vector<16x16xi32>
      %22 = arith.addi %21, %20 : vector<16x16xi32>
      %c16_i32_14 = arith.constant 16 : i32
      %23 = arith.muli %arg2, %c16_i32_14 : i32
      %24 = tpu.iota {dimensions = array<i32: 1>} : vector<16x16xi32>
      %25 = vector.broadcast %23 : i32 to vector<16x16xi32>
      %26 = arith.addi %25, %24 : vector<16x16xi32>
      %27 = arith.cmpi sle, %26, %22 : vector<16x16xi32>
      %cst_15 = arith.constant -1.000000e+30 : f32
      %28 = vector.broadcast %cst_15 : f32 to vector<16x16xf32>
      %29 = arith.select %27, %18, %28 : vector<16x16xi1>, vector<16x16xf32>
      %c0_16 = arith.constant 0 : index
      %c0_17 = arith.constant 0 : index
      %30 = vector.load %arg7[%c0_16, %c0_17] : memref<16x1xf32, #tpu.memory_space<vmem>>, vector<16x1xf32>
      %cst_18 = arith.constant dense<0xFF800000> : vector<16xf32>
      %31 = vector.multi_reduction <maximumf>, %29, %cst_18 [1] : vector<16x16xf32> to vector<16xf32>
      %32 = vector.shape_cast %31 : vector<16xf32> to vector<16x1xf32>
      %33 = arith.maximumf %30, %32 : vector<16x1xf32>
      %34 = arith.subf %30, %33 : vector<16x1xf32>
      %35 = math.exp %34 : vector<16x1xf32>
      %36 = vector.broadcast %33 : vector<16x1xf32> to vector<16x16xf32>
      %37 = arith.subf %29, %36 : vector<16x16xf32>
      %38 = math.exp %37 : vector<16x16xf32>
      %c0_19 = arith.constant 0 : index
      %c0_20 = arith.constant 0 : index
      %39 = vector.load %arg8[%c0_19, %c0_20] : memref<16x1xf32, #tpu.memory_space<vmem>>, vector<16x1xf32>
      %40 = arith.mulf %35, %39 : vector<16x1xf32>
      %cst_21 = arith.constant dense<0.000000e+00> : vector<16xf32>
      %41 = vector.multi_reduction <add>, %38, %cst_21 [1] : vector<16x16xf32> to vector<16xf32>
      %42 = vector.shape_cast %41 : vector<16xf32> to vector<16x1xf32>
      %43 = arith.addf %40, %42 : vector<16x1xf32>
      %c0_22 = arith.constant 0 : index
      %c0_23 = arith.constant 0 : index
      %44 = vector.load %arg8[%c0_22, %c0_23] : memref<16x1xf32, #tpu.memory_space<vmem>>, vector<16x1xf32>
      tpu.vector_store %arg8[%c0_22, %c0_23], %43 {strides = array<i32>} : memref<16x1xf32, #tpu.memory_space<vmem>>, vector<16x1xf32>,
      %c0_24 = arith.constant 0 : index
      %c0_25 = arith.constant 0 : index
      %45 = vector.load %arg9[%c0_24, %c0_25] : memref<16x16xf32, #tpu.memory_space<vmem>>, vector<16x16xf32>
      %46 = vector.broadcast %35 : vector<16x1xf32> to vector<16x16xf32>
      %47 = arith.mulf %46, %45 : vector<16x16xf32>
      %48 = arith.truncf %38 : vector<16x16xf32> to vector<16x16xbf16>
      %cst_26 = arith.constant dense<0.000000e+00> : vector<16x16xf32>
      %49 = tpu.matmul %48, %17, %cst_26 {dimension_numbers = #tpu.dot_dimension_numbers<[1], [0], [0], [1], [0, 0, 1, 1], [], []>} : vector<16x16xbf16>, vector<16x16xbf16>, vector<16x16xf32> -> vector<16x16xf32>
      %50 = arith.addf %47, %49 : vector<16x16xf32>
      %c0_27 = arith.constant 0 : index
      %c0_28 = arith.constant 0 : index
      %51 = vector.load %arg9[%c0_27, %c0_28] : memref<16x16xf32, #tpu.memory_space<vmem>>, vector<16x16xf32>
      tpu.vector_store %arg9[%c0_27, %c0_28], %50 {strides = array<i32>} : memref<16x16xf32, #tpu.memory_space<vmem>>, vector<16x16xf32>,
      %c0_29 = arith.constant 0 : index
      %c0_30 = arith.constant 0 : index
      %52 = vector.load %arg7[%c0_29, %c0_30] : memref<16x1xf32, #tpu.memory_space<vmem>>, vector<16x1xf32>
      tpu.vector_store %arg7[%c0_29, %c0_30], %33 {strides = array<i32>} : memref<16x1xf32, #tpu.memory_space<vmem>>, vector<16x1xf32>,
    } else {
    }
    %c0_i32_3 = arith.constant 0 : i32
    %9 = arith.cmpi eq, %arg2, %c0_i32_3 : i32
    %10 = arith.extui %9 : i1 to i32
    %c0_i32_4 = arith.constant 0 : i32
    %11 = arith.cmpi ne, %10, %c0_i32_4 : i32
    scf.if %11 {
      %c0 = arith.constant 0 : index
      %c0_5 = arith.constant 0 : index
      %12 = vector.load %arg9[%c0, %c0_5] : memref<16x16xf32, #tpu.memory_space<vmem>>, vector<16x16xf32>
      %c0_6 = arith.constant 0 : index
      %c0_7 = arith.constant 0 : index
      %13 = vector.load %arg8[%c0_6, %c0_7] : memref<16x1xf32, #tpu.memory_space<vmem>>, vector<16x1xf32>
      %14 = tpu.reciprocal %13 {approx = true} : vector<16x1xf32> -> vector<16x1xf32>
      %15 = vector.broadcast %14 : vector<16x1xf32> to vector<16x16xf32>
      %16 = arith.mulf %12, %15 : vector<16x16xf32>
      %17 = arith.truncf %16 : vector<16x16xf32> to vector<16x16xbf16>
      %c0_8 = arith.constant 0 : index
      %c0_9 = arith.constant 0 : index
      %c0_10 = arith.constant 0 : index
      %18 = vector.load %arg6[%c0_8, %c0_9, %c0_10] : memref<1x16x16xbf16, #tpu.memory_space<vmem>>, vector<1x16x16xbf16>
      %19 = vector.shape_cast %18 : vector<1x16x16xbf16> to vector<16x16xbf16>
      %20 = vector.shape_cast %17 : vector<16x16xbf16> to vector<1x16x16xbf16>
      tpu.vector_store %arg6[%c0_8, %c0_9, %c0_10], %20 {strides = array<i32>} : memref<1x16x16xbf16, #tpu.memory_space<vmem>>, vector<1x16x16xbf16>,
    } else {
    }
    return
  }
  func.func @transform_0(%arg0: i32, %arg1: i32, %arg2: i32) -> (i32, i32, i32) {
    %c0_i32 = arith.constant 0 : i32
    %c0_i32_0 = arith.constant 0 : i32
    return %arg0, %arg1, %c0_i32 : i32, i32, i32
  }
  func.func @transform_1(%arg0: i32, %arg1: i32, %arg2: i32) -> (i32, i32, i32) {
    %c0_i32 = arith.constant 0 : i32
    %c0_i32_0 = arith.constant 0 : i32
    return %arg0, %arg2, %c0_i32 : i32, i32, i32
  }
  func.func @transform_2(%arg0: i32, %arg1: i32, %arg2: i32) -> (i32, i32, i32) {
    %c0_i32 = arith.constant 0 : i32
    %c0_i32_0 = arith.constant 0 : i32
    return %arg0, %arg2, %c0_i32 : i32, i32, i32
  }
  func.func @transform_3(%arg0: i32, %arg1: i32, %arg2: i32) -> (i32, i32, i32) {
    %c0_i32 = arith.constant 0 : i32
    %c0_i32_0 = arith.constant 0 : i32
    return %arg0, %arg1, %c0_i32 : i32, i32, i32
  }
}

module attributes {stable_mosaic.version = 11 : i64} {
  func.func @_matmul_kernel(%arg0: i32, %arg1: i32, %arg2: i32, %arg3: memref<32x64xbf16, #tpu.memory_space<vmem>>, %arg4: memref<64x64xbf16, #tpu.memory_space<vmem>>, %arg5: memref<1x64xbf16, #tpu.memory_space<vmem>>, %arg6: memref<32x64xbf16, #tpu.memory_space<vmem>>, %arg7: memref<32x64xbf16, #tpu.memory_space<vmem>>, %arg8: memref<32x64xf32, #tpu.memory_space<vmem>>) attributes {dimension_semantics = [#tpu.dimension_semantics<parallel>, #tpu.dimension_semantics<parallel>, #tpu.dimension_semantics<arbitrary>], iteration_bounds = array<i64: 1, 1, 1>, scalar_prefetch = 0 : i64, scratch_operands = 1 : i64, tpu.core_type = #tpu.core_type<tc>, window_params = [{transform_indices = @transform_0, window_bounds = array<i64: 32, 64>}, {transform_indices = @transform_1, window_bounds = array<i64: 64, 64>}, {transform_indices = @transform_2, window_bounds = array<i64: 1, 64>}, {transform_indices = @transform_3, window_bounds = array<i64: 32, 64>}, {transform_indices = @transform_4, window_bounds = array<i64: 32, 64>}]} {
    %c0_i32 = arith.constant 0 : i32
    %0 = arith.cmpi eq, %arg2, %c0_i32 : i32
    %1 = arith.extui %0 : i1 to i32
    %c0_i32_0 = arith.constant 0 : i32
    %2 = arith.cmpi ne, %1, %c0_i32_0 : i32
    scf.if %2 {
      %cst_10 = arith.constant 0.000000e+00 : f32
      %12 = vector.broadcast %cst_10 : f32 to vector<32x64xf32>
      %c0_11 = arith.constant 0 : index
      %c0_12 = arith.constant 0 : index
      %13 = vector.load %arg8[%c0_11, %c0_12] : memref<32x64xf32, #tpu.memory_space<vmem>>, vector<32x64xf32>
      tpu.vector_store %arg8[%c0_11, %c0_12], %12 {strides = array<i32>} : memref<32x64xf32, #tpu.memory_space<vmem>>, vector<32x64xf32>,
    } else {
    }
    %c0 = arith.constant 0 : index
    %c0_1 = arith.constant 0 : index
    %3 = vector.load %arg8[%c0, %c0_1] : memref<32x64xf32, #tpu.memory_space<vmem>>, vector<32x64xf32>
    %c0_2 = arith.constant 0 : index
    %c0_3 = arith.constant 0 : index
    %4 = vector.load %arg3[%c0_2, %c0_3] : memref<32x64xbf16, #tpu.memory_space<vmem>>, vector<32x64xbf16>
    %c0_4 = arith.constant 0 : index
    %c0_5 = arith.constant 0 : index
    %5 = vector.load %arg4[%c0_4, %c0_5] : memref<64x64xbf16, #tpu.memory_space<vmem>>, vector<64x64xbf16>
    %cst = arith.constant dense<0.000000e+00> : vector<32x64xf32>
    %6 = tpu.matmul %4, %5, %cst {dimension_numbers = #tpu.dot_dimension_numbers<[1], [0], [0], [1], [0, 0, 1, 1], [], []>} : vector<32x64xbf16>, vector<64x64xbf16>, vector<32x64xf32> -> vector<32x64xf32>
    %7 = arith.addf %3, %6 : vector<32x64xf32>
    %c0_6 = arith.constant 0 : index
    %c0_7 = arith.constant 0 : index
    %8 = vector.load %arg8[%c0_6, %c0_7] : memref<32x64xf32, #tpu.memory_space<vmem>>, vector<32x64xf32>
    tpu.vector_store %arg8[%c0_6, %c0_7], %7 {strides = array<i32>} : memref<32x64xf32, #tpu.memory_space<vmem>>, vector<32x64xf32>,
    %c0_i32_8 = arith.constant 0 : i32
    %9 = arith.cmpi eq, %arg2, %c0_i32_8 : i32
    %10 = arith.extui %9 : i1 to i32
    %c0_i32_9 = arith.constant 0 : i32
    %11 = arith.cmpi ne, %10, %c0_i32_9 : i32
    scf.if %11 {
      %c0_10 = arith.constant 0 : index
      %c0_11 = arith.constant 0 : index
      %12 = vector.load %arg8[%c0_10, %c0_11] : memref<32x64xf32, #tpu.memory_space<vmem>>, vector<32x64xf32>
      %c0_12 = arith.constant 0 : index
      %c0_13 = arith.constant 0 : index
      %13 = vector.load %arg5[%c0_12, %c0_13] : memref<1x64xbf16, #tpu.memory_space<vmem>>, vector<1x64xbf16>
      %14 = arith.extf %13 : vector<1x64xbf16> to vector<1x64xf32>
      %15 = vector.broadcast %14 : vector<1x64xf32> to vector<32x64xf32>
      %16 = arith.addf %12, %15 : vector<32x64xf32>
      %c0_14 = arith.constant 0 : index
      %c0_15 = arith.constant 0 : index
      %17 = vector.load %arg6[%c0_14, %c0_15] : memref<32x64xbf16, #tpu.memory_space<vmem>>, vector<32x64xbf16>
      %18 = arith.extf %17 : vector<32x64xbf16> to vector<32x64xf32>
      %19 = arith.addf %16, %18 : vector<32x64xf32>
      %20 = arith.truncf %19 : vector<32x64xf32> to vector<32x64xbf16>
      %c0_16 = arith.constant 0 : index
      %c0_17 = arith.constant 0 : index
      %21 = vector.load %arg7[%c0_16, %c0_17] : memref<32x64xbf16, #tpu.memory_space<vmem>>, vector<32x64xbf16>
      tpu.vector_store %arg7[%c0_16, %c0_17], %20 {strides = array<i32>} : memref<32x64xbf16, #tpu.memory_space<vmem>>, vector<32x64xbf16>,
    } else {
    }
    return
  }
  func.func @transform_0(%arg0: i32, %arg1: i32, %arg2: i32) -> (i32, i32) {
    %c0_i32 = arith.constant 0 : i32
    return %arg0, %arg2 : i32, i32
  }
  func.func @transform_1(%arg0: i32, %arg1: i32, %arg2: i32) -> (i32, i32) {
    %c0_i32 = arith.constant 0 : i32
    return %arg2, %arg1 : i32, i32
  }
  func.func @transform_2(%arg0: i32, %arg1: i32, %arg2: i32) -> (i32, i32) {
    %c0_i32 = arith.constant 0 : i32
    %c0_i32_0 = arith.constant 0 : i32
    return %c0_i32, %arg1 : i32, i32
  }
  func.func @transform_3(%arg0: i32, %arg1: i32, %arg2: i32) -> (i32, i32) {
    %c0_i32 = arith.constant 0 : i32
    return %arg0, %arg1 : i32, i32
  }
  func.func @transform_4(%arg0: i32, %arg1: i32, %arg2: i32) -> (i32, i32) {
    %c0_i32 = arith.constant 0 : i32
    return %arg0, %arg1 : i32, i32
  }
}

module attributes {stable_mosaic.version = 11 : i64} {
  func.func @_ln_matmul_kernel(%arg0: i32, %arg1: i32, %arg2: memref<32x64xbf16, #tpu.memory_space<vmem>>, %arg3: memref<1x64xf32, #tpu.memory_space<vmem>>, %arg4: memref<1x64xf32, #tpu.memory_space<vmem>>, %arg5: memref<64x256xbf16, #tpu.memory_space<vmem>>, %arg6: memref<1x256xbf16, #tpu.memory_space<vmem>>, %arg7: memref<32x256xbf16, #tpu.memory_space<vmem>>, %arg8: memref<32x64xbf16, #tpu.memory_space<vmem>>) attributes {dimension_semantics = [#tpu.dimension_semantics<parallel>, #tpu.dimension_semantics<arbitrary>], iteration_bounds = array<i64: 1, 1>, scalar_prefetch = 0 : i64, scratch_operands = 1 : i64, tpu.core_type = #tpu.core_type<tc>, window_params = [{transform_indices = @transform_0, window_bounds = array<i64: 32, 64>}, {pipeline_mode = #tpu.pipeline_mode<synchronous>, transform_indices = @transform_1, window_bounds = array<i64: 1, 64>}, {pipeline_mode = #tpu.pipeline_mode<synchronous>, transform_indices = @transform_2, window_bounds = array<i64: 1, 64>}, {transform_indices = @transform_3, window_bounds = array<i64: 64, 256>}, {transform_indices = @transform_4, window_bounds = array<i64: 1, 256>}, {transform_indices = @transform_5, window_bounds = array<i64: 32, 256>}]} {
    %c0_i32 = arith.constant 0 : i32
    %0 = arith.cmpi eq, %arg1, %c0_i32 : i32
    %1 = arith.extui %0 : i1 to i32
    %c0_i32_0 = arith.constant 0 : i32
    %2 = arith.cmpi ne, %1, %c0_i32_0 : i32
    scf.if %2 {
      %c0_11 = arith.constant 0 : index
      %c0_12 = arith.constant 0 : index
      %20 = vector.load %arg2[%c0_11, %c0_12] : memref<32x64xbf16, #tpu.memory_space<vmem>>, vector<32x64xbf16>
      %21 = arith.extf %20 : vector<32x64xbf16> to vector<32x64xf32>
      %cst_13 = arith.constant dense<0.000000e+00> : vector<32xf32>
      %22 = vector.multi_reduction <add>, %21, %cst_13 [1] : vector<32x64xf32> to vector<32xf32>
      %23 = vector.shape_cast %22 : vector<32xf32> to vector<32x1xf32>
      %cst_14 = arith.constant 6.400000e+01 : f32
      %24 = vector.broadcast %cst_14 : f32 to vector<32x1xf32>
      %25 = arith.divf %23, %24 : vector<32x1xf32>
      %26 = vector.broadcast %25 : vector<32x1xf32> to vector<32x64xf32>
      %27 = arith.subf %21, %26 : vector<32x64xf32>
      %28 = arith.mulf %27, %27 : vector<32x64xf32>
      %cst_15 = arith.constant dense<0.000000e+00> : vector<32xf32>
      %29 = vector.multi_reduction <add>, %28, %cst_15 [1] : vector<32x64xf32> to vector<32xf32>
      %30 = vector.shape_cast %29 : vector<32xf32> to vector<32x1xf32>
      %cst_16 = arith.constant 6.400000e+01 : f32
      %31 = vector.broadcast %cst_16 : f32 to vector<32x1xf32>
      %32 = arith.divf %30, %31 : vector<32x1xf32>
      %33 = vector.broadcast %25 : vector<32x1xf32> to vector<32x64xf32>
      %34 = arith.subf %21, %33 : vector<32x64xf32>
      %cst_17 = arith.constant 9.99999974E-6 : f32
      %35 = vector.broadcast %cst_17 : f32 to vector<32x1xf32>
      %36 = arith.addf %32, %35 : vector<32x1xf32>
      %37 = math.rsqrt %36 : vector<32x1xf32>
      %38 = vector.broadcast %37 : vector<32x1xf32> to vector<32x64xf32>
      %39 = arith.mulf %34, %38 : vector<32x64xf32>
      %c0_18 = arith.constant 0 : index
      %c0_19 = arith.constant 0 : index
      %40 = vector.load %arg3[%c0_18, %c0_19] : memref<1x64xf32, #tpu.memory_space<vmem>>, vector<1x64xf32>
      %41 = vector.broadcast %40 : vector<1x64xf32> to vector<32x64xf32>
      %42 = arith.mulf %39, %41 : vector<32x64xf32>
      %c0_20 = arith.constant 0 : index
      %c0_21 = arith.constant 0 : index
      %43 = vector.load %arg4[%c0_20, %c0_21] : memref<1x64xf32, #tpu.memory_space<vmem>>, vector<1x64xf32>
      %44 = vector.broadcast %43 : vector<1x64xf32> to vector<32x64xf32>
      %45 = arith.addf %42, %44 : vector<32x64xf32>
      %46 = arith.truncf %45 : vector<32x64xf32> to vector<32x64xbf16>
      %c0_22 = arith.constant 0 : index
      %c0_23 = arith.constant 0 : index
      %47 = vector.load %arg8[%c0_22, %c0_23] : memref<32x64xbf16, #tpu.memory_space<vmem>>, vector<32x64xbf16>
      tpu.vector_store %arg8[%c0_22, %c0_23], %46 {strides = array<i32>} : memref<32x64xbf16, #tpu.memory_space<vmem>>, vector<32x64xbf16>,
    } else {
    }
    %c0 = arith.constant 0 : index
    %c0_1 = arith.constant 0 : index
    %3 = vector.load %arg8[%c0, %c0_1] : memref<32x64xbf16, #tpu.memory_space<vmem>>, vector<32x64xbf16>
    %c0_2 = arith.constant 0 : index
    %c0_3 = arith.constant 0 : index
    %4 = vector.load %arg5[%c0_2, %c0_3] : memref<64x256xbf16, #tpu.memory_space<vmem>>, vector<64x256xbf16>
    %cst = arith.constant dense<0.000000e+00> : vector<32x256xf32>
    %5 = tpu.matmul %3, %4, %cst {dimension_numbers = #tpu.dot_dimension_numbers<[1], [0], [0], [1], [0, 0, 1, 1], [], []>} : vector<32x64xbf16>, vector<64x256xbf16>, vector<32x256xf32> -> vector<32x256xf32>
    %c0_4 = arith.constant 0 : index
    %c0_5 = arith.constant 0 : index
    %6 = vector.load %arg6[%c0_4, %c0_5] : memref<1x256xbf16, #tpu.memory_space<vmem>>, vector<1x256xbf16>
    %7 = arith.extf %6 : vector<1x256xbf16> to vector<1x256xf32>
    %8 = vector.broadcast %7 : vector<1x256xf32> to vector<32x256xf32>
    %9 = arith.addf %5, %8 : vector<32x256xf32>
    %cst_6 = arith.constant 5.000000e-01 : f32
    %10 = vector.broadcast %cst_6 : f32 to vector<32x256xf32>
    %11 = arith.mulf %10, %9 : vector<32x256xf32>
    %cst_7 = arith.constant 0.707106769 : f32
    %12 = vector.broadcast %cst_7 : f32 to vector<32x256xf32>
    %13 = arith.mulf %9, %12 : vector<32x256xf32>
    %14 = math.erf %13 : vector<32x256xf32>
    %cst_8 = arith.constant 1.000000e+00 : f32
    %15 = vector.broadcast %cst_8 : f32 to vector<32x256xf32>
    %16 = arith.addf %15, %14 : vector<32x256xf32>
    %17 = arith.mulf %11, %16 : vector<32x256xf32>
    %18 = arith.truncf %17 : vector<32x256xf32> to vector<32x256xbf16>
    %c0_9 = arith.constant 0 : index
    %c0_10 = arith.constant 0 : index
    %19 = vector.load %arg7[%c0_9, %c0_10] : memref<32x256xbf16, #tpu.memory_space<vmem>>, vector<32x256xbf16>
    tpu.vector_store %arg7[%c0_9, %c0_10], %18 {strides = array<i32>} : memref<32x256xbf16, #tpu.memory_space<vmem>>, vector<32x256xbf16>,
    return
  }
  func.func @transform_0(%arg0: i32, %arg1: i32) -> (i32, i32) {
    %c0_i32 = arith.constant 0 : i32
    %c0_i32_0 = arith.constant 0 : i32
    return %arg0, %c0_i32 : i32, i32
  }
  func.func @transform_1(%arg0: i32, %arg1: i32) -> (i32, i32) {
    %c0_i32 = arith.constant 0 : i32
    %c0_i32_0 = arith.constant 0 : i32
    %c0_i32_1 = arith.constant 0 : i32
    return %c0_i32, %c0_i32_0 : i32, i32
  }
  func.func @transform_2(%arg0: i32, %arg1: i32) -> (i32, i32) {
    %c0_i32 = arith.constant 0 : i32
    %c0_i32_0 = arith.constant 0 : i32
    %c0_i32_1 = arith.constant 0 : i32
    return %c0_i32, %c0_i32_0 : i32, i32
  }
  func.func @transform_3(%arg0: i32, %arg1: i32) -> (i32, i32) {
    %c0_i32 = arith.constant 0 : i32
    %c0_i32_0 = arith.constant 0 : i32
    return %c0_i32, %arg1 : i32, i32
  }
  func.func @transform_4(%arg0: i32, %arg1: i32) -> (i32, i32) {
    %c0_i32 = arith.constant 0 : i32
    %c0_i32_0 = arith.constant 0 : i32
    return %c0_i32, %arg1 : i32, i32
  }
  func.func @transform_5(%arg0: i32, %arg1: i32) -> (i32, i32) {
    %c0_i32 = arith.constant 0 : i32
    return %arg0, %arg1 : i32, i32
  }
}

module attributes {stable_mosaic.version = 11 : i64} {
  func.func @_matmul_kernel(%arg0: i32, %arg1: i32, %arg2: i32, %arg3: memref<32x256xbf16, #tpu.memory_space<vmem>>, %arg4: memref<256x64xbf16, #tpu.memory_space<vmem>>, %arg5: memref<1x64xbf16, #tpu.memory_space<vmem>>, %arg6: memref<32x64xbf16, #tpu.memory_space<vmem>>, %arg7: memref<32x64xbf16, #tpu.memory_space<vmem>>, %arg8: memref<32x64xf32, #tpu.memory_space<vmem>>) attributes {dimension_semantics = [#tpu.dimension_semantics<parallel>, #tpu.dimension_semantics<parallel>, #tpu.dimension_semantics<arbitrary>], iteration_bounds = array<i64: 1, 1, 1>, scalar_prefetch = 0 : i64, scratch_operands = 1 : i64, tpu.core_type = #tpu.core_type<tc>, window_params = [{transform_indices = @transform_0, window_bounds = array<i64: 32, 256>}, {transform_indices = @transform_1, window_bounds = array<i64: 256, 64>}, {transform_indices = @transform_2, window_bounds = array<i64: 1, 64>}, {transform_indices = @transform_3, window_bounds = array<i64: 32, 64>}, {transform_indices = @transform_4, window_bounds = array<i64: 32, 64>}]} {
    %c0_i32 = arith.constant 0 : i32
    %0 = arith.cmpi eq, %arg2, %c0_i32 : i32
    %1 = arith.extui %0 : i1 to i32
    %c0_i32_0 = arith.constant 0 : i32
    %2 = arith.cmpi ne, %1, %c0_i32_0 : i32
    scf.if %2 {
      %cst_10 = arith.constant 0.000000e+00 : f32
      %12 = vector.broadcast %cst_10 : f32 to vector<32x64xf32>
      %c0_11 = arith.constant 0 : index
      %c0_12 = arith.constant 0 : index
      %13 = vector.load %arg8[%c0_11, %c0_12] : memref<32x64xf32, #tpu.memory_space<vmem>>, vector<32x64xf32>
      tpu.vector_store %arg8[%c0_11, %c0_12], %12 {strides = array<i32>} : memref<32x64xf32, #tpu.memory_space<vmem>>, vector<32x64xf32>,
    } else {
    }
    %c0 = arith.constant 0 : index
    %c0_1 = arith.constant 0 : index
    %3 = vector.load %arg8[%c0, %c0_1] : memref<32x64xf32, #tpu.memory_space<vmem>>, vector<32x64xf32>
    %c0_2 = arith.constant 0 : index
    %c0_3 = arith.constant 0 : index
    %4 = vector.load %arg3[%c0_2, %c0_3] : memref<32x256xbf16, #tpu.memory_space<vmem>>, vector<32x256xbf16>
    %c0_4 = arith.constant 0 : index
    %c0_5 = arith.constant 0 : index
    %5 = vector.load %arg4[%c0_4, %c0_5] : memref<256x64xbf16, #tpu.memory_space<vmem>>, vector<256x64xbf16>
    %cst = arith.constant dense<0.000000e+00> : vector<32x64xf32>
    %6 = tpu.matmul %4, %5, %cst {dimension_numbers = #tpu.dot_dimension_numbers<[1], [0], [0], [1], [0, 0, 1, 1], [], []>} : vector<32x256xbf16>, vector<256x64xbf16>, vector<32x64xf32> -> vector<32x64xf32>
    %7 = arith.addf %3, %6 : vector<32x64xf32>
    %c0_6 = arith.constant 0 : index
    %c0_7 = arith.constant 0 : index
    %8 = vector.load %arg8[%c0_6, %c0_7] : memref<32x64xf32, #tpu.memory_space<vmem>>, vector<32x64xf32>
    tpu.vector_store %arg8[%c0_6, %c0_7], %7 {strides = array<i32>} : memref<32x64xf32, #tpu.memory_space<vmem>>, vector<32x64xf32>,
    %c0_i32_8 = arith.constant 0 : i32
    %9 = arith.cmpi eq, %arg2, %c0_i32_8 : i32
    %10 = arith.extui %9 : i1 to i32
    %c0_i32_9 = arith.constant 0 : i32
    %11 = arith.cmpi ne, %10, %c0_i32_9 : i32
    scf.if %11 {
      %c0_10 = arith.constant 0 : index
      %c0_11 = arith.constant 0 : index
      %12 = vector.load %arg8[%c0_10, %c0_11] : memref<32x64xf32, #tpu.memory_space<vmem>>, vector<32x64xf32>
      %c0_12 = arith.constant 0 : index
      %c0_13 = arith.constant 0 : index
      %13 = vector.load %arg5[%c0_12, %c0_13] : memref<1x64xbf16, #tpu.memory_space<vmem>>, vector<1x64xbf16>
      %14 = arith.extf %13 : vector<1x64xbf16> to vector<1x64xf32>
      %15 = vector.broadcast %14 : vector<1x64xf32> to vector<32x64xf32>
      %16 = arith.addf %12, %15 : vector<32x64xf32>
      %c0_14 = arith.constant 0 : index
      %c0_15 = arith.constant 0 : index
      %17 = vector.load %arg6[%c0_14, %c0_15] : memref<32x64xbf16, #tpu.memory_space<vmem>>, vector<32x64xbf16>
      %18 = arith.extf %17 : vector<32x64xbf16> to vector<32x64xf32>
      %19 = arith.addf %16, %18 : vector<32x64xf32>
      %20 = arith.truncf %19 : vector<32x64xf32> to vector<32x64xbf16>
      %c0_16 = arith.constant 0 : index
      %c0_17 = arith.constant 0 : index
      %21 = vector.load %arg7[%c0_16, %c0_17] : memref<32x64xbf16, #tpu.memory_space<vmem>>, vector<32x64xbf16>
      tpu.vector_store %arg7[%c0_16, %c0_17], %20 {strides = array<i32>} : memref<32x64xbf16, #tpu.memory_space<vmem>>, vector<32x64xbf16>,
    } else {
    }
    return
  }
  func.func @transform_0(%arg0: i32, %arg1: i32, %arg2: i32) -> (i32, i32) {
    %c0_i32 = arith.constant 0 : i32
    return %arg0, %arg2 : i32, i32
  }
  func.func @transform_1(%arg0: i32, %arg1: i32, %arg2: i32) -> (i32, i32) {
    %c0_i32 = arith.constant 0 : i32
    return %arg2, %arg1 : i32, i32
  }
  func.func @transform_2(%arg0: i32, %arg1: i32, %arg2: i32) -> (i32, i32) {
    %c0_i32 = arith.constant 0 : i32
    %c0_i32_0 = arith.constant 0 : i32
    return %c0_i32, %arg1 : i32, i32
  }
  func.func @transform_3(%arg0: i32, %arg1: i32, %arg2: i32) -> (i32, i32) {
    %c0_i32 = arith.constant 0 : i32
    return %arg0, %arg1 : i32, i32
  }
  func.func @transform_4(%arg0: i32, %arg1: i32, %arg2: i32) -> (i32, i32) {
    %c0_i32 = arith.constant 0 : i32
    return %arg0, %arg1 : i32, i32
  }
}

module attributes {stable_mosaic.version = 11 : i64} {
  func.func @_ln_matmul_kernel(%arg0: i32, %arg1: i32, %arg2: memref<32x64xbf16, #tpu.memory_space<vmem>>, %arg3: memref<1x64xf32, #tpu.memory_space<vmem>>, %arg4: memref<1x64xf32, #tpu.memory_space<vmem>>, %arg5: memref<64x256xbf16, #tpu.memory_space<vmem>>, %arg6: memref<32x256xbf16, #tpu.memory_space<vmem>>, %arg7: memref<32x64xbf16, #tpu.memory_space<vmem>>) attributes {dimension_semantics = [#tpu.dimension_semantics<parallel>, #tpu.dimension_semantics<arbitrary>], iteration_bounds = array<i64: 1, 1>, scalar_prefetch = 0 : i64, scratch_operands = 1 : i64, tpu.core_type = #tpu.core_type<tc>, window_params = [{transform_indices = @transform_0, window_bounds = array<i64: 32, 64>}, {pipeline_mode = #tpu.pipeline_mode<synchronous>, transform_indices = @transform_1, window_bounds = array<i64: 1, 64>}, {pipeline_mode = #tpu.pipeline_mode<synchronous>, transform_indices = @transform_2, window_bounds = array<i64: 1, 64>}, {transform_indices = @transform_3, window_bounds = array<i64: 64, 256>}, {transform_indices = @transform_4, window_bounds = array<i64: 32, 256>}]} {
    %c0_i32 = arith.constant 0 : i32
    %0 = arith.cmpi eq, %arg1, %c0_i32 : i32
    %1 = arith.extui %0 : i1 to i32
    %c0_i32_0 = arith.constant 0 : i32
    %2 = arith.cmpi ne, %1, %c0_i32_0 : i32
    scf.if %2 {
      %c0_6 = arith.constant 0 : index
      %c0_7 = arith.constant 0 : index
      %8 = vector.load %arg2[%c0_6, %c0_7] : memref<32x64xbf16, #tpu.memory_space<vmem>>, vector<32x64xbf16>
      %9 = arith.extf %8 : vector<32x64xbf16> to vector<32x64xf32>
      %cst_8 = arith.constant dense<0.000000e+00> : vector<32xf32>
      %10 = vector.multi_reduction <add>, %9, %cst_8 [1] : vector<32x64xf32> to vector<32xf32>
      %11 = vector.shape_cast %10 : vector<32xf32> to vector<32x1xf32>
      %cst_9 = arith.constant 6.400000e+01 : f32
      %12 = vector.broadcast %cst_9 : f32 to vector<32x1xf32>
      %13 = arith.divf %11, %12 : vector<32x1xf32>
      %14 = vector.broadcast %13 : vector<32x1xf32> to vector<32x64xf32>
      %15 = arith.subf %9, %14 : vector<32x64xf32>
      %16 = arith.mulf %15, %15 : vector<32x64xf32>
      %cst_10 = arith.constant dense<0.000000e+00> : vector<32xf32>
      %17 = vector.multi_reduction <add>, %16, %cst_10 [1] : vector<32x64xf32> to vector<32xf32>
      %18 = vector.shape_cast %17 : vector<32xf32> to vector<32x1xf32>
      %cst_11 = arith.constant 6.400000e+01 : f32
      %19 = vector.broadcast %cst_11 : f32 to vector<32x1xf32>
      %20 = arith.divf %18, %19 : vector<32x1xf32>
      %21 = vector.broadcast %13 : vector<32x1xf32> to vector<32x64xf32>
      %22 = arith.subf %9, %21 : vector<32x64xf32>
      %cst_12 = arith.constant 9.99999974E-6 : f32
      %23 = vector.broadcast %cst_12 : f32 to vector<32x1xf32>
      %24 = arith.addf %20, %23 : vector<32x1xf32>
      %25 = math.rsqrt %24 : vector<32x1xf32>
      %26 = vector.broadcast %25 : vector<32x1xf32> to vector<32x64xf32>
      %27 = arith.mulf %22, %26 : vector<32x64xf32>
      %c0_13 = arith.constant 0 : index
      %c0_14 = arith.constant 0 : index
      %28 = vector.load %arg3[%c0_13, %c0_14] : memref<1x64xf32, #tpu.memory_space<vmem>>, vector<1x64xf32>
      %29 = vector.broadcast %28 : vector<1x64xf32> to vector<32x64xf32>
      %30 = arith.mulf %27, %29 : vector<32x64xf32>
      %c0_15 = arith.constant 0 : index
      %c0_16 = arith.constant 0 : index
      %31 = vector.load %arg4[%c0_15, %c0_16] : memref<1x64xf32, #tpu.memory_space<vmem>>, vector<1x64xf32>
      %32 = vector.broadcast %31 : vector<1x64xf32> to vector<32x64xf32>
      %33 = arith.addf %30, %32 : vector<32x64xf32>
      %34 = arith.truncf %33 : vector<32x64xf32> to vector<32x64xbf16>
      %c0_17 = arith.constant 0 : index
      %c0_18 = arith.constant 0 : index
      %35 = vector.load %arg7[%c0_17, %c0_18] : memref<32x64xbf16, #tpu.memory_space<vmem>>, vector<32x64xbf16>
      tpu.vector_store %arg7[%c0_17, %c0_18], %34 {strides = array<i32>} : memref<32x64xbf16, #tpu.memory_space<vmem>>, vector<32x64xbf16>,
    } else {
    }
    %c0 = arith.constant 0 : index
    %c0_1 = arith.constant 0 : index
    %3 = vector.load %arg7[%c0, %c0_1] : memref<32x64xbf16, #tpu.memory_space<vmem>>, vector<32x64xbf16>
    %c0_2 = arith.constant 0 : index
    %c0_3 = arith.constant 0 : index
    %4 = vector.load %arg5[%c0_2, %c0_3] : memref<64x256xbf16, #tpu.memory_space<vmem>>, vector<64x256xbf16>
    %cst = arith.constant dense<0.000000e+00> : vector<32x256xf32>
    %5 = tpu.matmul %3, %4, %cst {dimension_numbers = #tpu.dot_dimension_numbers<[1], [0], [0], [1], [0, 0, 1, 1], [], []>} : vector<32x64xbf16>, vector<64x256xbf16>, vector<32x256xf32> -> vector<32x256xf32>
    %6 = arith.truncf %5 : vector<32x256xf32> to vector<32x256xbf16>
    %c0_4 = arith.constant 0 : index
    %c0_5 = arith.constant 0 : index
    %7 = vector.load %arg6[%c0_4, %c0_5] : memref<32x256xbf16, #tpu.memory_space<vmem>>, vector<32x256xbf16>
    tpu.vector_store %arg6[%c0_4, %c0_5], %6 {strides = array<i32>} : memref<32x256xbf16, #tpu.memory_space<vmem>>, vector<32x256xbf16>,
    return
  }
  func.func @transform_0(%arg0: i32, %arg1: i32) -> (i32, i32) {
    %c0_i32 = arith.constant 0 : i32
    %c0_i32_0 = arith.constant 0 : i32
    return %arg0, %c0_i32 : i32, i32
  }
  func.func @transform_1(%arg0: i32, %arg1: i32) -> (i32, i32) {
    %c0_i32 = arith.constant 0 : i32
    %c0_i32_0 = arith.constant 0 : i32
    %c0_i32_1 = arith.constant 0 : i32
    return %c0_i32, %c0_i32_0 : i32, i32
  }
  func.func @transform_2(%arg0: i32, %arg1: i32) -> (i32, i32) {
    %c0_i32 = arith.constant 0 : i32
    %c0_i32_0 = arith.constant 0 : i32
    %c0_i32_1 = arith.constant 0 : i32
    return %c0_i32, %c0_i32_0 : i32, i32
  }
  func.func @transform_3(%arg0: i32, %arg1: i32) -> (i32, i32) {
    %c0_i32 = arith.constant 0 : i32
    %c0_i32_0 = arith.constant 0 : i32
    return %c0_i32, %arg1 : i32, i32
  }
  func.func @transform_4(%arg0: i32, %arg1: i32) -> (i32, i32) {
    %c0_i32 = arith.constant 0 : i32
    return %arg0, %arg1 : i32, i32
  }
}

</mosaic_0001>

<bundles_post_ra>
// kernel: forward.11
= control target key start
LH: loop header
LB: loop body
LE: loop exit
PB: predicated region body
PF: predicated region fallthrough
CT: control target
= control target key end

     0   :  { %vm33_vm0 = vcmask 523264   ;;  %v378_v38 = vmov 0   ;;  %vm125_vm1 = vcmask 519168   ;;  %vm297_vm2 = vcmask 1043456   ;;  %s506_s0 = inlined_call_operand.vmem [shape: bf16[32,64], index: 0, kind: input, shape index: {}]   ;;  %s507_s3 = inlined_call_operand.vmem [shape: bf16[64,192], index: 3, kind: input, shape index: {}]   ;;  %s508_s1 = inlined_call_operand.vmem [shape: f32[1,64], index: 1, kind: input, shape index: {}]   ;;  %s509_s2 = inlined_call_operand.vmem [shape: f32[1,64], index: 2, kind: input, shape index: {}]   ;;  %s510_s4 = inlined_call_operand.vmem [shape: bf16[1,192], index: 4, kind: input, shape index: {}]   ;;  %s511_s5 = inlined_call_operand.vmem [shape: bf16[32,192], index: 5, kind: output, shape index: {}]  }
   0x1   :  { %v339_v0 = vld [vmem:[%s506_s0] sm:$0xff]   ;;  %v346_v1 = vld [vmem:[%s506_s0 + $0x8] sm:$0xff]   ;;  %v356_v30 = vld [vmem:[%s507_s3 + $0x34] ss:$8 sps:$4 sm:$0xff]   ;;  %252 = vmatprep.mubr.bf16.mxu0 %v378_v38  ;;  %262 = vmatprep.mubr.bf16.mxu1 %v378_v38  ;;  %vm298_vm3 = vcmask 523268  }
   0x2   :  { %v340_v2 = vunpack.c.l.bf16 %v339_v0  ;;  %v344_v3 = vunpack.c.l.bf16 %v346_v1  ;;  %v341_v4 = vunpack.c.h.bf16 %v339_v0  ;;  %v345_v5 = vunpack.c.h.bf16 %v346_v1  ;;  %v358_v31 = vld [vmem:[%s507_s3 + $0x30] ss:$8 sps:$4 sm:$0xff]   ;;  %228 = vmatprep.subr.bf16.mxu0 %v356_v30  ;;  %347 = vmatprep.subr.bf16.mxu1 %v356_v30  ;;  %v359_v32 = vld [vmem:[%s507_s3 + $0x24] ss:$8 sps:$4 sm:$0xff]   ;;  %v361_v33 = vld [vmem:[%s507_s3 + $0x20] ss:$8 sps:$4 sm:$0xff]  }
   0x3   :  { %229 = vmatpush1.bf16.msra.mxu0 %v358_v31  ;;  %351 = vmatpush1.bf16.msra.mxu1 %v358_v31  ;;  %v362_v34 = vld [vmem:[%s507_s3 + $0x14] ss:$8 sps:$4 sm:$0xff]   ;;  %v364_v35 = vld [vmem:[%s507_s3 + $0x10] ss:$8 sps:$4 sm:$0xff]   ;;  %v365_v36 = vld [vmem:[%s507_s3 + $0x4] ss:$8 sps:$4 sm:$0xff]  }
   0x4   :  { %v34_v6 = vsel %vm33_vm0, %v340_v2, 0.0  ;;  %v40_v7 = vsel %vm33_vm0, %v344_v3, 0.0  ;;  %v37_v8 = vsel %vm33_vm0, %v341_v4, 0.0  ;;  %v43_v9 = vsel %vm33_vm0, %v345_v5, 0.0  ;;  %230 = vmatprep.subr.bf16.mxu0 %v359_v32  ;;  %348 = vmatprep.subr.bf16.mxu1 %v359_v32  ;;  %v367_v37 = vld [vmem:[%s507_s3] ss:$8 sps:$4 sm:$0xff]   ;;  %vm482_vm4 = vmor %vm298_vm3, %vm297_vm2 }
   0x5   :  { %35 = vadd.xlane.f32.xlu0 %v34_v6  ;;  %41 = vadd.xlane.f32.xlu1 %v40_v7  ;;  %v308_v52 = vld [vmem:[%s508_s1] ss:$0 sm:$0xff] }
   0x6   :  { %v309_v54 = vld [vmem:[%s509_s2] ss:$0 sm:$0xff] }
   0x7   :  { %231 = vmatpush1.bf16.msra.mxu0 %v361_v33  ;;  %352 = vmatpush1.bf16.msra.mxu1 %v361_v33 }
   0x8   :  { %232 = vmatprep.subr.bf16.mxu0 %v362_v34  ;;  %349 = vmatprep.subr.bf16.mxu1 %v362_v34 }
   0x9   :  { %38 = vadd.xlane.f32.xlu0 %v37_v8  ;;  %44 = vadd.xlane.f32.xlu1 %v43_v9 }
   0xb   :  { %233 = vmatpush1.bf16.msra.mxu0 %v364_v35  ;;  %353 = vmatpush1.bf16.msra.mxu1 %v364_v35 }
   0xc   :  { %234 = vmatprep.subr.bf16.mxu0 %v365_v36  ;;  %350 = vmatprep.subr.bf16.mxu1 %v365_v36 }
   0xf   :  { %235 = vmatpush1.bf16.msra.mxu0 %v367_v37  ;;  %354 = vmatpush1.bf16.msra.mxu1 %v367_v37 }
  0x8e   :  { %v36_v10 = vpop.xlane.xlu0 %35  ;;  %v42_v11 = vpop.xlane.xlu1 %41 }
  0x8f   :  { %v47_v12 = vmul.f32 0.015625, %v36_v10  ;;  %v49_v13 = vmul.f32 0.015625, %v42_v11  ;;  %v145_v11 = vlaneseq }
  0x91   :  { %v419_v14 = vsub.f32 %v340_v2, %v47_v12  ;;  %v421_v15 = vsub.f32 %v344_v3, %v49_v13  ;;  %v146_v12 = vshrl.u32 %v145_v11, 7  ;;  %v142_v13 = vld [vmem:[%s510_s4] sm:$0x3] }
  0x92   :  { %v39_v16 = vpop.xlane.xlu0 %38  ;;  %v45_v17 = vpop.xlane.xlu1 %44 }
  0x93   :  { %v48_v18 = vmul.f32 0.015625, %v39_v16  ;;  %v50_v19 = vmul.f32 0.015625, %v45_v17  ;;  %v55_v20 = vmul.f32 %v419_v14, %v419_v14  ;;  %v57_v21 = vmul.f32 %v421_v15, %v421_v15 }
  0x94   :  { %v151_v16 = vsub.s32 2, %v146_v12 }
  0x95   :  { %v427_v22 = vsub.f32 %v341_v4, %v48_v18  ;;  %v429_v23 = vsub.f32 %v345_v5, %v50_v19  ;;  %v59_v24 = vsel %vm33_vm0, %v55_v20, 0.0  ;;  %v65_v25 = vsel %vm33_vm0, %v57_v21, 0.0 }
  0x96   :  { %60 = vadd.xlane.f32.xlu0 %v59_v24 }
  0x97   :  { %v56_v26 = vmul.f32 %v427_v22, %v427_v22  ;;  %v58_v27 = vmul.f32 %v429_v23, %v429_v23 }
  0x99   :  { %v62_v28 = vsel %vm33_vm0, %v56_v26, 0.0  ;;  %v68_v29 = vsel %vm33_vm0, %v58_v27, 0.0 }
  0x9a   :  { %66 = vadd.xlane.f32.xlu0 %v65_v25  ;;  %63 = vadd.xlane.f32.xlu1 %v62_v28 }
  0x9e   :  { %69 = vadd.xlane.f32.xlu1 %v68_v29 }
 0x11f   :  { %v61_v39 = vpop.xlane.xlu0 %60 }
 0x120   :  { %v71_v40 = vmul.f32 0.015625, %v61_v39 }
 0x122   :  { %v75_v41 = vadd.f32 1e-05, %v71_v40 }
 0x123   :  { %v64_v42 = vpop.xlane.xlu1 %63  ;;  %v67_v43 = vpop.xlane.xlu0 %66 }
 0x124   :  { %370 = vrsqrt.f32 %v75_v41  ;;  %v72_v44 = vmul.f32 0.015625, %v64_v42  ;;  %v73_v45 = vmul.f32 0.015625, %v67_v43 }
 0x126   :  { %v76_v46 = vadd.f32 1e-05, %v72_v44  ;;  %v77_v47 = vadd.f32 1e-05, %v73_v45 }
 0x127   :  { %v70_v48 = vpop.xlane.xlu1 %69 }
 0x128   :  { %372 = vrsqrt.f32 %v76_v46  ;;  %v74_v49 = vmul.f32 0.015625, %v70_v48 }
 0x129   :  { %374 = vrsqrt.f32 %v77_v47 }
 0x12a   :  { %v78_v50 = vadd.f32 1e-05, %v74_v49 }
 0x12c   :  { %376 = vrsqrt.f32 %v78_v50 }
 0x131   :  { %v371_v51 = vpop.eup %370 }
 0x132   :  { %v83_v53 = vmul.f32 %v371_v51, %v419_v14  ;;  %v143_v14 = vunpack.c.l.bf16 %v142_v13 }
 0x134   :  { %v94_v55 = vmul.f32 %v308_v52, %v83_v53  ;;  %v152_v18 = vrot.slane %v143_v14, %v151_v16 }
 0x135   :  { %v373_v56 = vpop.eup %372 }
 0x136   :  { %v375_v57 = vpop.eup %374  ;;  %v105_v58 = vadd.f32 %v309_v54, %v94_v55  ;;  %v84_v59 = vmul.f32 %v373_v56, %v427_v22 }
 0x137   :  { %v85_v60 = vmul.f32 %v375_v57, %v421_v15  ;;  %v147_v15 = vsub.s32 0, %v146_v12 }
 0x138   :  { %v330_v61 = vpack.c.bf16 %v105_v58, %v105_v58  ;;  %v95_v62 = vmul.f32 %v308_v52, %v84_v59 }
 0x139   :  { %v377_v63 = vpop.eup %376  ;;  %v96_v0 = vmul.f32 %v308_v52, %v85_v60  ;;  %v148_v17 = vrot.slane %v143_v14, %v147_v15  ;;  %v162_v20 = vrot.slane %v152_v18, %v147_v15 }
 0x13a   :  { %126 = vst.msk [vmem:[#allocation2] sm:$0xf] %vm125_vm1, %v330_v61  ;;  %v106_v1 = vadd.f32 %v309_v54, %v95_v62  ;;  %v86_v2 = vmul.f32 %v377_v63, %v429_v23 }
 0x13b   :  { %v107_v3 = vadd.f32 %v309_v54, %v96_v0  ;;  %v158_v19 = vrot.slane %v148_v17, %v147_v15 }
 0x13c   :  { %v331_v4 = vpack.c.bf16 %v106_v1, %v106_v1  ;;  %v97_v5 = vmul.f32 %v308_v52, %v86_v2 }
 0x13d   :  { %v332_v6 = vpack.c.bf16 %v107_v3, %v107_v3 }
 0x13e   :  { %127 = vst.msk [vmem:[#allocation2 + $0x4] sm:$0xf] %vm125_vm1, %v331_v4  ;;  %v108_v7 = vadd.f32 %v309_v54, %v97_v5 }
 0x13f   :  { %128 = vst.msk [vmem:[#allocation2 + $0x8] sm:$0xf] %vm125_vm1, %v332_v6 }
 0x140   :  { %v333_v8 = vpack.c.bf16 %v108_v7, %v108_v7 }
 0x142   :  { %129 = vst.msk [vmem:[#allocation2 + $0xc] sm:$0xf] %vm125_vm1, %v333_v8 }
 0x145   :  { %v368_v9 = vld [vmem:[#allocation2] sm:$0xff]  }
 0x146   :  { %324 = vmatmul.mubr.msk.bf16.vlgmr.msra.gmra.mxu0 %vm33_vm0, %v368_v9 }
 0x149   :  { %v369_v10 = vld [vmem:[#allocation2 + $0x8] sm:$0xff]  }
 0x14a   :  { %325 = vmatmul.mubr.msk.bf16.vlgmr.msra.gmra.mxu1 %vm33_vm0, %v369_v10 }
 0x206   :  { %v254_v21 = vpop.f32.mrf.mxu0 }
 0x207   :  { %v255_v23 = vadd.f32 %v254_v21, %v158_v19 }
 0x208   :  { %v256_v22 = vpop.f32.mrf.mxu0 }
 0x209   :  { %v257_v24 = vadd.f32 %v256_v22, %v162_v20 }
 0x20a   :  { %v258_v26 = vpop.f32.mrf.mxu0  ;;  %v264_v27 = vpop.f32.mrf.mxu1 }
 0x20b   :  { %v334_v28 = vpack.c.bf16 %v257_v24, %v255_v23  ;;  %v259_v31 = vadd.f32 %v258_v26, %v158_v19  ;;  %v265_v32 = vadd.f32 %v264_v27, %v158_v19 }
 0x20c   :  { %v260_v29 = vpop.f32.mrf.mxu0  ;;  %v266_v30 = vpop.f32.mrf.mxu1 }
 0x20d   :  { %300 = vst.msk [vmem:[%s511_s5] sm:$0xff] %vm482_vm4, %v334_v28  ;;  %v261_v33 = vadd.f32 %v260_v29, %v162_v20  ;;  %v267_v34 = vadd.f32 %v266_v30, %v162_v20 }
 0x20e   :  { %v268_v35 = vpop.f32.mrf.mxu1 }
 0x20f   :  { %v335_v36 = vpack.c.bf16 %v261_v33, %v259_v31  ;;  %v336_v37 = vpack.c.bf16 %v267_v34, %v265_v32  ;;  %v269_v39 = vadd.f32 %v268_v35, %v158_v19 }
 0x210   :  { %v270_v38 = vpop.f32.mrf.mxu1 }
 0x211   :  { %301 = vst.msk [vmem:[%s511_s5 + $0x8] sm:$0xff] %vm482_vm4, %v335_v36  ;;  %302 = vst.msk [vmem:[%s511_s5 + $0x10] sm:$0xff] %vm482_vm4, %v336_v37  ;;  %v271_v40 = vadd.f32 %v270_v38, %v162_v20 }
 0x213   :  { %v337_v41 = vpack.c.bf16 %v271_v40, %v269_v39 }
 0x215   :  { %303 = vst.msk [vmem:[%s511_s5 + $0x18] sm:$0xff] %vm482_vm4, %v337_v41 }

// kernel: forward.12
= control target key start
LH: loop header
LB: loop body
LE: loop exit
PB: predicated region body
PF: predicated region fallthrough
CT: control target
= control target key end

     0   :  { %s800_s12 = smov 0   ;;  %s802_s13 = smov 0   ;;  %s864_s0 = inlined_call_operand.vmem [shape: bf16[8,16,16], index: 0, kind: input, shape index: {}]   ;;  %s865_s1 = inlined_call_operand.vmem [shape: bf16[8,16,16], index: 1, kind: input, shape index: {}]   ;;  %s866_s2 = inlined_call_operand.vmem [shape: bf16[8,16,16], index: 2, kind: input, shape index: {}]   ;;  %s867_s3 = inlined_call_operand.vmem [shape: bf16[8,16,16], index: 3, kind: output, shape index: {}]  }
   0x1   :  { %s804_s14 = smov 0  }
   0x2 LB: > { %s32_s15 = sadd.s32 1, %s770_s13  ;;  %p667_p0 = scmp.ge.s32.totalorder %s774_s14, 1  ;;  %s774_s14 = sphi %s804_s14, %s13_s14   ;;  %s770_s13 = sphi %s802_s13, %s869_s13   ;;  %s766_s12 = sphi %s800_s12, %s868_s12  }
   0x3   : > { %p34_p1 = scmp.ge.s32.totalorder %s32_s15, 8  ;;  %p199_p2 = scmp.lt.s32.totalorder %s774_s14, 9 }
   0x5   : > { %s871_s15 = smov (%p34_p1, %s32_s15), 0  ;;  %p200_p3 = pnand %p667_p0, %p199_p2 }
   0x6   : > { %p250_p4 = scmp.lt.s32.totalorder (!%p200_p3), %s766_s12, 7 }
   0x7   : > { %203 = sbr.rel (%p200_p3) target bundleno = 797 (0x31d), region = 32 }
   0xc   : > { %vm299_vm0 = vcmask 130048   ;;  %v776_v0 = vmov 0.0   ;;  %vm777_vm1 = vmmov 0   ;;  %s873_s12 = smov (!%p250_p4, %s766_s12), 7  ;;  %vm294_vm2 = vcmask 7168  }
   0xd   : > { %695 = vmatprep.subr.bf16.mxu0 %v776_v0  ;;  %300 = vst.msk [vmem:[#allocation4] sm:$0xff] %vm299_vm0, %v776_v0  ;;  %301 = vst.msk [vmem:[#allocation4 + $0x8] sm:$0xff] %vm299_vm0, %v776_v0  ;;  %697 = vmatprep.mubr.msk.bf16.mxu0 %vm777_vm1, %v776_v0  ;;  %s820_s16 = sshll.u32 %s873_s12, 3  ;;  %v778_v4 = vmov -1e+30   ;;  %v373_v5 = vlaneseq  ;;  %v779_v17 = vmov 0  }
   0xe   : > { %701 = vmatprep.subr.bf16.mxu1 %v776_v0  ;;  %703 = vmatprep.mubr.msk.bf16.mxu1 %vm777_vm1, %v776_v0  ;;  %s267_s19 = scalar_lea.vmem %s865_s1, %s820_s16  ;;  %s257_s22 = scalar_lea.vmem %s864_s0, %s820_s16  ;;  %295 = vst.msk [vmem:[#allocation2] sm:$0xff] %vm294_vm2, %v778_v4  ;;  %296 = vst.msk [vmem:[#allocation2 + $0x8] sm:$0xff] %vm294_vm2, %v778_v4  ;;  %vm534_vm5 = vcmask 125952  }
   0xf   : > { %v737_v1 = vld [vmem:[%s267_s19] sm:$0xff]   ;;  %297 = vst.msk [vmem:[#allocation3] sm:$0xff] %vm294_vm2, %v776_v0  ;;  %298 = vst.msk [vmem:[#allocation3 + $0x8] sm:$0xff] %vm294_vm2, %v776_v0  ;;  %v374_v6 = vshrl.u32 %v373_v5, 7  ;;  %v380_v7 = vand.u32 127, %v373_v5  ;;  %735 = vset.pattern.permute.xlu1 %v779_v17  ;;  %736 = vset.pattern.permute.xlu0 %v779_v17  ;;  %s277_s25 = scalar_lea.vmem %s866_s2, %s820_s16  ;;  %s287_s28 = scalar_lea.vmem %s867_s3, %s820_s16 }
  0x10   : > { %v330_v2 = vsel %vm299_vm0, %v737_v1, 0  ;;  %v738_v3 = vld [vmem:[%s257_s22] sm:$0xff]  }
  0x11   : > { %696 = vmatpush3.bf16.xpose.msra.mxu0 %v330_v2  ;;  %vm383_vm3 = vcmp.le.s32.totalorder %v380_v7, %v374_v6  ;;  %v375_v8 = vadd.s32 8, %v374_v6  ;;  %v739_v26 = vld [vmem:[%s277_s25] sm:$0xff]  }
  0x12   : > { %702 = vmatpush3.bf16.msra.mxu1 %v739_v26 }
  0x13   : > { %vm384_vm4 = vcmp.le.s32.totalorder %v380_v7, %v375_v8 }
  0x14   : > { %v434_v54 = vld [vmem:[#allocation4] sm:$0xff]  ;;  %v435_v57 = vld [vmem:[#allocation4 + $0x8] sm:$0xff] }
  0x15   : > { %v387_v18 = vld [vmem:[#allocation2] sm:$0xff]  ;;  %v388_v21 = vld [vmem:[#allocation2 + $0x8] sm:$0xff] }
  0x16   : > { %v419_v42 = vld [vmem:[#allocation3] sm:$0xff]  ;;  %v420_v45 = vld [vmem:[#allocation3 + $0x8] sm:$0xff] }
  0x18   : > { %698 = vmatmul.mubr.msk.bf16.vlgmr.msra.gmra.mxu0 %vm299_vm0, %v738_v3 }
  0xd8   : > { %v366_v9 = vpop.f32.mrf.mxu0 }
  0xd9   : > { %v385_v10 = vsel %vm383_vm3, %v366_v9, -1e+30 }
  0xda   : > { %v699_v11 = vpop.f32.mrf.mxu0  ;;  %v389_v12 = vsel %vm299_vm0, %v385_v10, -inf }
  0xdb   : > { %390 = vmax.xlane.f32.xlu0 %v389_v12 }
  0xdc   : > { %v369_v13 = vpop.f32.mrf.mxu0 }
  0xdd   : > { %v386_v14 = vsel %vm384_vm4, %v369_v13, -1e+30 }
  0xde   : > { %v700_v15 = vpop.f32.mrf.mxu0  ;;  %v392_v16 = vsel %vm299_vm0, %v386_v14, -inf }
  0xdf   : > { %393 = vmax.xlane.f32.xlu0 %v392_v16 }
 0x164   : > { %v391_v19 = vpop.xlane.xlu0 %390 }
 0x165   : > { %v395_v20 = vmax.f32 %v387_v18, %v391_v19 }
 0x167   : > { %v397_v22 = vsub.f32 %v387_v18, %v395_v20  ;;  %503 = vst.msk [vmem:[#allocation2] sm:$0xff] %vm294_vm2, %v395_v20  ;;  %405 = vperm.xlu1 %735, %v395_v20  }
 0x168   : > { %v394_v23 = vpop.xlane.xlu0 %393 }
 0x169   : > { %v396_v24 = vmax.f32 %v388_v21, %v394_v23  ;;  %v399_v39 = vmul.f32 1.442695, %v397_v22 }
 0x16b   : > { %v398_v25 = vsub.f32 %v388_v21, %v396_v24  ;;  %504 = vst.msk [vmem:[#allocation2 + $0x8] sm:$0xff] %vm294_vm2, %v396_v24  ;;  %410 = vperm.xlu1 %735, %v396_v24  }
 0x16d   : > { %v401_v36 = vmul.f32 1.442695, %v398_v25 }
 0x1e2   : > { %v406_v27 = vpop.permute.xlu1 %405 }
 0x1e3   : > { %v413_v28 = vsub.f32 %v385_v10, %v406_v27 }
 0x1e5   : > { %v415_v29 = vmul.f32 1.442695, %v413_v28 }
 0x1e6   : > { %v411_v30 = vpop.permute.xlu1 %410 }
 0x1e7   : > { %740 = vpow2.f32 %v415_v29  ;;  %v414_v31 = vsub.f32 %v386_v14, %v411_v30 }
 0x1e9   : > { %v417_v32 = vmul.f32 1.442695, %v414_v31 }
 0x1eb   : > { %742 = vpow2.f32 %v417_v32 }
 0x1ec   : > { %744 = vpow2.f32 %v401_v36 }
 0x1ed   : > { %746 = vpow2.f32 %v399_v39 }
 0x1f4   : > { %v741_v33 = vpop.eup %740 }
 0x1f5   : > { %v423_v34 = vsel %vm299_vm0, %v741_v33, 0.0 }
 0x1f6   : > { %424 = vadd.xlane.f32.xlu0 %v423_v34 }
 0x1f8   : > { %v743_v35 = vpop.eup %742 }
 0x1f9   : > { %v426_v37 = vsel %vm299_vm0, %v743_v35, 0.0  ;;  %v448_v38 = vpack.c.bf16 %v743_v35, %v741_v33  ;;  %v745_v40 = vpop.eup %744 }
 0x1fa   : > { %427 = vadd.xlane.f32.xlu1 %v426_v37  ;;  %v747_v41 = vpop.eup %746  ;;  %v422_v47 = vmul.f32 %v745_v40, %v420_v45 }
 0x1fb   : > { %704 = vmatmul.mubr.msk.bf16.vlgmr.msra.gmra.mxu1 %vm299_vm0, %v448_v38  ;;  %v421_v43 = vmul.f32 %v747_v41, %v419_v42 }
 0x20b   : > { %443 = vperm.xlu1 %735, %v745_v40  }
 0x20c   : > { %438 = vperm.xlu0 %736, %v747_v41  }
 0x27f   : > { %v425_v44 = vpop.xlane.xlu0 %424 }
 0x280   : > { %v429_v46 = vadd.f32 %v425_v44, %v421_v43 }
 0x282   : > { %432 = vst.msk [vmem:[#allocation3] sm:$0xff] %vm294_vm2, %v429_v46 }
 0x283   : > { %v428_v48 = vpop.xlane.xlu1 %427 }
 0x284   : > { %v430_v49 = vadd.f32 %v428_v48, %v422_v47 }
 0x286   : > { %433 = vst.msk [vmem:[#allocation3 + $0x8] sm:$0xff] %vm294_vm2, %v430_v49 }
 0x287   : > { %v439_v55 = vpop.permute.xlu0 %438  ;;  %v444_v58 = vpop.permute.xlu1 %443 }
 0x288   : > { %v446_v56 = vmul.f32 %v439_v55, %v434_v54  ;;  %v447_v62 = vmul.f32 %v444_v58, %v435_v57 }
 0x289   : > { %v510_v50 = vld [vmem:[#allocation3] sm:$0xff] }
 0x28a   : > { %748 = vrcp.f32 %v510_v50 }
 0x28d   : > { %v511_v51 = vld [vmem:[#allocation3 + $0x8] sm:$0xff] }
 0x28e   : > { %750 = vrcp.f32 %v511_v51 }
 0x297   : > { %v749_v52 = vpop.eup %748 }
 0x298   : > { %516 = vperm.xlu0 %736, %v749_v52  }
 0x29b   : > { %v751_v53 = vpop.eup %750 }
 0x29c   : > { %521 = vperm.xlu0 %736, %v751_v53  }
 0x2bb   : > { %v492_v59 = vpop.f32.mrf.mxu1 }
 0x2bc   : > { %v499_v60 = vadd.f32 %v492_v59, %v446_v56 }
 0x2bd   : > { %v705_v61 = vpop.f32.mrf.mxu1 }
 0x2be   : > { %501 = vst.msk [vmem:[#allocation4] sm:$0xff] %vm299_vm0, %v499_v60 }
 0x2bf   : > { %v495_v63 = vpop.f32.mrf.mxu1 }
 0x2c0   : > { %v500_v0 = vadd.f32 %v495_v63, %v447_v62 }
 0x2c1   : > { %v706_v1 = vpop.f32.mrf.mxu1 }
 0x2c2   : > { %502 = vst.msk [vmem:[#allocation4 + $0x8] sm:$0xff] %vm299_vm0, %v500_v0 }
 0x2c5   : > { %v508_v2 = vld [vmem:[#allocation4] sm:$0xff] }
 0x2c9   : > { %v509_v6 = vld [vmem:[#allocation4 + $0x8] sm:$0xff] }
 0x313   : > { %v517_v3 = vpop.permute.xlu0 %516 }
 0x314   : > { %v524_v4 = vmul.f32 %v517_v3, %v508_v2 }
 0x316   : > { %v689_v5 = vpack.c.bf16 %v524_v4, %v524_v4 }
 0x317   : > { %v522_v7 = vpop.permute.xlu0 %521 }
 0x318   : > { %535 = vst.msk [vmem:[%s287_s28] sm:$0xf] %vm534_vm5, %v689_v5  ;;  %v525_v8 = vmul.f32 %v522_v7, %v509_v6 }
 0x31a   : > { %v690_v9 = vpack.c.bf16 %v525_v8, %v525_v8 }
 0x31c   : > { %536 = vst.msk [vmem:[%s287_s28 + $0x4] sm:$0xf] %vm534_vm5, %v690_v9 }
 0x31d PF: > { %s13_s14 = sadd.s32 1, %s774_s14   ;;  %s868_s12 = smov %s770_s13 }
 0x31e   : > { %p10_p5 = scmp.ge.s32.totalorder %s13_s14, 10   ;;  %s869_s13 = smov %s871_s15 }
 0x320   :  { %12 = sbr.rel (!%p10_p5) target bundleno = 2 (0x2), region = 80 }

// kernel: forward.13
= control target key start
LH: loop header
LB: loop body
LE: loop exit
PB: predicated region body
PF: predicated region fallthrough
CT: control target
= control target key end

     0   :  { %vm22_vm0 = vcmask 523264   ;;  %v245_v1 = vmov 0.0   ;;  %v150_v7 = vlaneseq  ;;  %vm186_vm1 = vcmask 519168   ;;  %s324_s1 = inlined_call_operand.vmem [shape: bf16[64,64], index: 1, kind: input, shape index: {}]   ;;  %s325_s0 = inlined_call_operand.vmem [shape: bf16[32,64], index: 0, kind: input, shape index: {}]   ;;  %s326_s2 = inlined_call_operand.vmem [shape: bf16[1,64], index: 2, kind: input, shape index: {}]   ;;  %s327_s3 = inlined_call_operand.vmem [shape: bf16[32,64], index: 3, kind: input, shape index: {}]   ;;  %s328_s4 = inlined_call_operand.vmem [shape: bf16[32,64], index: 4, kind: output, shape index: {}]  }
   0x1   :  { %v239_v0 = vld [vmem:[%s324_s1 + $0x18] sm:$0xff]   ;;  %25 = vst.msk [vmem:[#allocation2 + $0x10] sm:$0xff] %vm22_vm0, %v245_v1  ;;  %23 = vst.msk [vmem:[#allocation2] sm:$0xff] %vm22_vm0, %v245_v1  ;;  %v240_v2 = vld [vmem:[%s324_s1 + $0x10] sm:$0xff]  }
   0x2   :  { %24 = vst.msk [vmem:[#allocation2 + $0x8] sm:$0xff] %vm22_vm0, %v245_v1  ;;  %26 = vst.msk [vmem:[#allocation2 + $0x18] sm:$0xff] %vm22_vm0, %v245_v1  ;;  %226 = vmatprep.subr.bf16.mxu0 %v239_v0  ;;  %v241_v3 = vld [vmem:[%s324_s1 + $0x8] sm:$0xff]   ;;  %v243_v4 = vld [vmem:[%s325_s0] sm:$0xff]   ;;  %v151_v9 = vshrl.u32 %v150_v7, 7 }
   0x3   :  { %227 = vmatpush3.bf16.msra.mxu0 %v239_v0  ;;  %234 = vmatprep.mubr.msk.bf16.mxu0 %vm22_vm0, %v243_v4  ;;  %v242_v5 = vld [vmem:[%s324_s1] sm:$0xff]   ;;  %v244_v6 = vld [vmem:[%s325_s0 + $0x8] sm:$0xff]  }
   0x4   :  { %228 = vmatprep.subr.bf16.mxu0 %v240_v2  ;;  %v148_v11 = vld [vmem:[%s326_s2] sm:$0x1]  ;;  %v152_v17 = vsub.s32 0, %v151_v9  ;;  %v219_v22 = vld [vmem:[%s327_s3 + $0x8] sm:$0xff]  }
   0x5   :  { %v149_v16 = vunpack.c.l.bf16 %v148_v11  ;;  %v212_v26 = vld [vmem:[%s327_s3] sm:$0xff]   ;;  %v217_v27 = vunpack.c.l.bf16 %v219_v22  ;;  %v218_v34 = vunpack.c.h.bf16 %v219_v22 }
   0x6   :  { %v213_v30 = vunpack.c.l.bf16 %v212_v26  ;;  %v214_v39 = vunpack.c.h.bf16 %v212_v26 }
   0x7   :  { %229 = vmatpush3.bf16.msra.mxu0 %v240_v2  ;;  %v153_v24 = vrot.slane %v149_v16, %v152_v17 }
   0x8   :  { %230 = vmatprep.subr.bf16.mxu0 %v241_v3  ;;  %v29_v8 = vld [vmem:[#allocation2 + $0x10] sm:$0xff]  ;;  %v27_v12 = vld [vmem:[#allocation2] sm:$0xff] }
   0x9   :  { %v30_v15 = vld [vmem:[#allocation2 + $0x18] sm:$0xff]  ;;  %v28_v20 = vld [vmem:[#allocation2 + $0x8] sm:$0xff] }
   0xb   :  { %231 = vmatpush3.bf16.msra.mxu0 %v241_v3 }
   0xc   :  { %232 = vmatprep.subr.bf16.mxu0 %v242_v5 }
   0xf   :  { %233 = vmatpush3.bf16.msra.mxu0 %v242_v5 }
  0x12   :  { %235 = vmatmul.mubr.msk.bf16.vlgmr.msra.gmra.mxu0 %vm22_vm0, %v244_v6 }
  0xd2   :  { %v236_v10 = vpop.f32.mrf.mxu0 }
  0xd3   :  { %v135_v13 = vadd.f32 %v236_v10, %v29_v8 }
  0xd4   :  { %v118_v14 = vpop.f32.mrf.mxu0 }
  0xd5   :  { %139 = vst.msk [vmem:[#allocation2 + $0x10] sm:$0xff] %vm22_vm0, %v135_v13  ;;  %v133_v18 = vadd.f32 %v118_v14, %v27_v12 }
  0xd6   :  { %v237_v19 = vpop.f32.mrf.mxu0 }
  0xd7   :  { %137 = vst.msk [vmem:[#allocation2] sm:$0xff] %vm22_vm0, %v133_v18  ;;  %v136_v21 = vadd.f32 %v237_v19, %v30_v15 }
  0xd8   :  { %v121_v23 = vpop.f32.mrf.mxu0 }
  0xd9   :  { %140 = vst.msk [vmem:[#allocation2 + $0x18] sm:$0xff] %vm22_vm0, %v136_v21  ;;  %v134_v25 = vadd.f32 %v121_v23, %v28_v20 }
  0xdb   :  { %138 = vst.msk [vmem:[#allocation2 + $0x8] sm:$0xff] %vm22_vm0, %v134_v25 }
  0xdc   :  { %v146_v28 = vld [vmem:[#allocation2 + $0x10] sm:$0xff] }
  0xdd   :  { %v156_v29 = vadd.f32 %v153_v24, %v146_v28 }
  0xde   :  { %v144_v31 = vld [vmem:[#allocation2] sm:$0xff] }
  0xdf   :  { %v168_v32 = vadd.f32 %v217_v27, %v156_v29  ;;  %v154_v33 = vadd.f32 %v153_v24, %v144_v31 }
  0xe0   :  { %v147_v35 = vld [vmem:[#allocation2 + $0x18] sm:$0xff] }
  0xe1   :  { %v209_v36 = vpack.c.bf16 %v168_v32, %v168_v32  ;;  %v166_v37 = vadd.f32 %v213_v30, %v154_v33  ;;  %v157_v38 = vadd.f32 %v153_v24, %v147_v35 }
  0xe2   :  { %v145_v40 = vld [vmem:[#allocation2 + $0x8] sm:$0xff] }
  0xe3   :  { %189 = vst.msk [vmem:[%s328_s4 + $0x8] sm:$0xf] %vm186_vm1, %v209_v36  ;;  %v207_v41 = vpack.c.bf16 %v166_v37, %v166_v37  ;;  %v169_v42 = vadd.f32 %v218_v34, %v157_v38  ;;  %v155_v43 = vadd.f32 %v153_v24, %v145_v40 }
  0xe5   :  { %187 = vst.msk [vmem:[%s328_s4] sm:$0xf] %vm186_vm1, %v207_v41  ;;  %v210_v44 = vpack.c.bf16 %v169_v42, %v169_v42  ;;  %v167_v45 = vadd.f32 %v214_v39, %v155_v43 }
  0xe7   :  { %190 = vst.msk [vmem:[%s328_s4 + $0xc] sm:$0xf] %vm186_vm1, %v210_v44  ;;  %v208_v46 = vpack.c.bf16 %v167_v45, %v167_v45 }
  0xe9   :  { %188 = vst.msk [vmem:[%s328_s4 + $0x4] sm:$0xf] %vm186_vm1, %v208_v46 }

// kernel: forward.14
= control target key start
LH: loop header
LB: loop body
LE: loop exit
PB: predicated region body
PF: predicated region fallthrough
CT: control target
= control target key end

     0   :  { %vm33_vm0 = vcmask 523264   ;;  %v431_v38 = vmov 0   ;;  %vm125_vm1 = vcmask 519168   ;;  %s547_s0 = inlined_call_operand.vmem [shape: bf16[32,64], index: 0, kind: input, shape index: {}]   ;;  %s548_s3 = inlined_call_operand.vmem [shape: bf16[64,256], index: 3, kind: input, shape index: {}]   ;;  %s549_s1 = inlined_call_operand.vmem [shape: f32[1,64], index: 1, kind: input, shape index: {}]   ;;  %s550_s2 = inlined_call_operand.vmem [shape: f32[1,64], index: 2, kind: input, shape index: {}]   ;;  %s551_s4 = inlined_call_operand.vmem [shape: bf16[1,256], index: 4, kind: input, shape index: {}]   ;;  %s552_s5 = inlined_call_operand.vmem [shape: bf16[32,256], index: 5, kind: output, shape index: {}]  }
   0x1   :  { %v376_v0 = vld [vmem:[%s547_s0] sm:$0xff]   ;;  %v383_v1 = vld [vmem:[%s547_s0 + $0x8] sm:$0xff]   ;;  %v393_v30 = vld [vmem:[%s548_s3 + $0x34] ss:$8 sps:$4 sm:$0xff]   ;;  %252 = vmatprep.mubr.bf16.mxu0 %v431_v38  ;;  %262 = vmatprep.mubr.bf16.mxu1 %v431_v38 }
   0x2   :  { %v377_v2 = vunpack.c.l.bf16 %v376_v0  ;;  %v381_v3 = vunpack.c.l.bf16 %v383_v1  ;;  %v378_v4 = vunpack.c.h.bf16 %v376_v0  ;;  %v382_v5 = vunpack.c.h.bf16 %v383_v1  ;;  %v395_v31 = vld [vmem:[%s548_s3 + $0x30] ss:$8 sps:$4 sm:$0xff]   ;;  %228 = vmatprep.subr.bf16.mxu0 %v393_v30  ;;  %384 = vmatprep.subr.bf16.mxu1 %v393_v30  ;;  %v396_v32 = vld [vmem:[%s548_s3 + $0x24] ss:$8 sps:$4 sm:$0xff]   ;;  %v398_v33 = vld [vmem:[%s548_s3 + $0x20] ss:$8 sps:$4 sm:$0xff]  }
   0x3   :  { %229 = vmatpush1.bf16.msra.mxu0 %v395_v31  ;;  %388 = vmatpush1.bf16.msra.mxu1 %v395_v31  ;;  %v399_v34 = vld [vmem:[%s548_s3 + $0x14] ss:$8 sps:$4 sm:$0xff]   ;;  %v401_v35 = vld [vmem:[%s548_s3 + $0x10] ss:$8 sps:$4 sm:$0xff]   ;;  %v402_v36 = vld [vmem:[%s548_s3 + $0x4] ss:$8 sps:$4 sm:$0xff]  }
   0x4   :  { %v34_v6 = vsel %vm33_vm0, %v377_v2, 0.0  ;;  %v40_v7 = vsel %vm33_vm0, %v381_v3, 0.0  ;;  %v37_v8 = vsel %vm33_vm0, %v378_v4, 0.0  ;;  %v43_v9 = vsel %vm33_vm0, %v382_v5, 0.0  ;;  %230 = vmatprep.subr.bf16.mxu0 %v396_v32  ;;  %385 = vmatprep.subr.bf16.mxu1 %v396_v32  ;;  %v404_v37 = vld [vmem:[%s548_s3] ss:$8 sps:$4 sm:$0xff]  }
   0x5   :  { %35 = vadd.xlane.f32.xlu0 %v34_v6  ;;  %41 = vadd.xlane.f32.xlu1 %v40_v7  ;;  %v345_v52 = vld [vmem:[%s549_s1] ss:$0 sm:$0xff] }
   0x6   :  { %v346_v54 = vld [vmem:[%s550_s2] ss:$0 sm:$0xff] }
   0x7   :  { %231 = vmatpush1.bf16.msra.mxu0 %v398_v33  ;;  %389 = vmatpush1.bf16.msra.mxu1 %v398_v33 }
   0x8   :  { %232 = vmatprep.subr.bf16.mxu0 %v399_v34  ;;  %386 = vmatprep.subr.bf16.mxu1 %v399_v34 }
   0x9   :  { %38 = vadd.xlane.f32.xlu0 %v37_v8  ;;  %44 = vadd.xlane.f32.xlu1 %v43_v9 }
   0xb   :  { %233 = vmatpush1.bf16.msra.mxu0 %v401_v35  ;;  %390 = vmatpush1.bf16.msra.mxu1 %v401_v35 }
   0xc   :  { %234 = vmatprep.subr.bf16.mxu0 %v402_v36  ;;  %387 = vmatprep.subr.bf16.mxu1 %v402_v36 }
   0xf   :  { %235 = vmatpush1.bf16.msra.mxu0 %v404_v37  ;;  %391 = vmatpush1.bf16.msra.mxu1 %v404_v37 }
  0x8e   :  { %v36_v10 = vpop.xlane.xlu0 %35  ;;  %v42_v11 = vpop.xlane.xlu1 %41 }
  0x8f   :  { %v47_v12 = vmul.f32 0.015625, %v36_v10  ;;  %v49_v13 = vmul.f32 0.015625, %v42_v11  ;;  %v145_v11 = vlaneseq }
  0x91   :  { %v472_v14 = vsub.f32 %v377_v2, %v47_v12  ;;  %v474_v15 = vsub.f32 %v381_v3, %v49_v13  ;;  %v146_v12 = vshrl.u32 %v145_v11, 7  ;;  %v142_v13 = vld [vmem:[%s551_s4] sm:$0x3] }
  0x92   :  { %v39_v16 = vpop.xlane.xlu0 %38  ;;  %v45_v17 = vpop.xlane.xlu1 %44 }
  0x93   :  { %v48_v18 = vmul.f32 0.015625, %v39_v16  ;;  %v50_v19 = vmul.f32 0.015625, %v45_v17  ;;  %v55_v20 = vmul.f32 %v472_v14, %v472_v14  ;;  %v57_v21 = vmul.f32 %v474_v15, %v474_v15 }
  0x94   :  { %v151_v16 = vsub.s32 2, %v146_v12 }
  0x95   :  { %v480_v22 = vsub.f32 %v378_v4, %v48_v18  ;;  %v482_v23 = vsub.f32 %v382_v5, %v50_v19  ;;  %v59_v24 = vsel %vm33_vm0, %v55_v20, 0.0  ;;  %v65_v25 = vsel %vm33_vm0, %v57_v21, 0.0 }
  0x96   :  { %60 = vadd.xlane.f32.xlu0 %v59_v24 }
  0x97   :  { %v56_v26 = vmul.f32 %v480_v22, %v480_v22  ;;  %v58_v27 = vmul.f32 %v482_v23, %v482_v23 }
  0x99   :  { %v62_v28 = vsel %vm33_vm0, %v56_v26, 0.0  ;;  %v68_v29 = vsel %vm33_vm0, %v58_v27, 0.0 }
  0x9a   :  { %66 = vadd.xlane.f32.xlu0 %v65_v25  ;;  %63 = vadd.xlane.f32.xlu1 %v62_v28 }
  0x9e   :  { %69 = vadd.xlane.f32.xlu1 %v68_v29 }
 0x11f   :  { %v61_v39 = vpop.xlane.xlu0 %60 }
 0x120   :  { %v71_v40 = vmul.f32 0.015625, %v61_v39 }
 0x122   :  { %v75_v41 = vadd.f32 1e-05, %v71_v40 }
 0x123   :  { %v64_v42 = vpop.xlane.xlu1 %63  ;;  %v67_v43 = vpop.xlane.xlu0 %66 }
 0x124   :  { %407 = vrsqrt.f32 %v75_v41  ;;  %v72_v44 = vmul.f32 0.015625, %v64_v42  ;;  %v73_v45 = vmul.f32 0.015625, %v67_v43 }
 0x126   :  { %v76_v46 = vadd.f32 1e-05, %v72_v44  ;;  %v77_v47 = vadd.f32 1e-05, %v73_v45 }
 0x127   :  { %v70_v48 = vpop.xlane.xlu1 %69 }
 0x128   :  { %409 = vrsqrt.f32 %v76_v46  ;;  %v74_v49 = vmul.f32 0.015625, %v70_v48 }
 0x129   :  { %411 = vrsqrt.f32 %v77_v47 }
 0x12a   :  { %v78_v50 = vadd.f32 1e-05, %v74_v49 }
 0x12c   :  { %413 = vrsqrt.f32 %v78_v50 }
 0x131   :  { %v408_v51 = vpop.eup %407 }
 0x132   :  { %v83_v53 = vmul.f32 %v408_v51, %v472_v14  ;;  %v143_v14 = vunpack.c.l.bf16 %v142_v13 }
 0x134   :  { %v94_v55 = vmul.f32 %v345_v52, %v83_v53  ;;  %v152_v18 = vrot.slane %v143_v14, %v151_v16 }
 0x135   :  { %v410_v56 = vpop.eup %409 }
 0x136   :  { %v412_v57 = vpop.eup %411  ;;  %v105_v58 = vadd.f32 %v346_v54, %v94_v55  ;;  %v84_v59 = vmul.f32 %v410_v56, %v480_v22 }
 0x137   :  { %v85_v60 = vmul.f32 %v412_v57, %v474_v15  ;;  %v147_v15 = vsub.s32 0, %v146_v12 }
 0x138   :  { %v367_v61 = vpack.c.bf16 %v105_v58, %v105_v58  ;;  %v95_v62 = vmul.f32 %v345_v52, %v84_v59 }
 0x139   :  { %v414_v63 = vpop.eup %413  ;;  %v96_v0 = vmul.f32 %v345_v52, %v85_v60  ;;  %v148_v17 = vrot.slane %v143_v14, %v147_v15  ;;  %v162_v20 = vrot.slane %v152_v18, %v147_v15 }
 0x13a   :  { %126 = vst.msk [vmem:[#allocation2] sm:$0xf] %vm125_vm1, %v367_v61  ;;  %v106_v1 = vadd.f32 %v346_v54, %v95_v62  ;;  %v86_v2 = vmul.f32 %v414_v63, %v482_v23 }
 0x13b   :  { %v107_v3 = vadd.f32 %v346_v54, %v96_v0  ;;  %v158_v19 = vrot.slane %v148_v17, %v147_v15 }
 0x13c   :  { %v368_v4 = vpack.c.bf16 %v106_v1, %v106_v1  ;;  %v97_v5 = vmul.f32 %v345_v52, %v86_v2 }
 0x13d   :  { %v369_v6 = vpack.c.bf16 %v107_v3, %v107_v3 }
 0x13e   :  { %127 = vst.msk [vmem:[#allocation2 + $0x4] sm:$0xf] %vm125_vm1, %v368_v4  ;;  %v108_v7 = vadd.f32 %v346_v54, %v97_v5 }
 0x13f   :  { %128 = vst.msk [vmem:[#allocation2 + $0x8] sm:$0xf] %vm125_vm1, %v369_v6 }
 0x140   :  { %v370_v8 = vpack.c.bf16 %v108_v7, %v108_v7 }
 0x142   :  { %129 = vst.msk [vmem:[#allocation2 + $0xc] sm:$0xf] %vm125_vm1, %v370_v8 }
 0x145   :  { %v405_v9 = vld [vmem:[#allocation2] sm:$0xff]  }
 0x146   :  { %361 = vmatmul.mubr.msk.bf16.vlgmr.msra.gmra.mxu0 %vm33_vm0, %v405_v9 }
 0x149   :  { %v406_v10 = vld [vmem:[#allocation2 + $0x8] sm:$0xff]  }
 0x14a   :  { %362 = vmatmul.mubr.msk.bf16.vlgmr.msra.gmra.mxu1 %vm33_vm0, %v406_v10 }
 0x206   :  { %v254_v21 = vpop.f32.mrf.mxu0 }
 0x207   :  { %v255_v22 = vadd.f32 %v254_v21, %v158_v19 }
 0x208   :  { %v256_v23 = vpop.f32.mrf.mxu0 }
 0x209   :  { %v281_v24 = vmul.f32 0.70710677, %v255_v22  ;;  %v257_v25 = vadd.f32 %v256_v23, %v162_v20  ;;  %v273_v48 = vmul.f32 0.5, %v255_v22 }
 0x20a   :  { %v258_v26 = vpop.f32.mrf.mxu0  ;;  %v264_v27 = vpop.f32.mrf.mxu1 }
 0x20b   :  { %415 = verf.f32 %v281_v24  ;;  %v282_v28 = vmul.f32 0.70710677, %v257_v25  ;;  %v259_v29 = vadd.f32 %v258_v26, %v158_v19  ;;  %v265_v30 = vadd.f32 %v264_v27, %v158_v19 }
 0x20c   :  { %v260_v31 = vpop.f32.mrf.mxu0  ;;  %v266_v32 = vpop.f32.mrf.mxu1  ;;  %v274_v49 = vmul.f32 0.5, %v257_v25 }
 0x20d   :  { %417 = verf.f32 %v282_v28  ;;  %v283_v33 = vmul.f32 0.70710677, %v259_v29  ;;  %v261_v34 = vadd.f32 %v260_v31, %v162_v20  ;;  %v285_v35 = vmul.f32 0.70710677, %v265_v30 }
 0x20e   :  { %v267_v36 = vadd.f32 %v266_v32, %v162_v20  ;;  %v268_v37 = vpop.f32.mrf.mxu1  ;;  %v275_v60 = vmul.f32 0.5, %v259_v29  ;;  %v277_v0 = vmul.f32 0.5, %v265_v30 }
 0x20f   :  { %419 = verf.f32 %v283_v33  ;;  %v284_v38 = vmul.f32 0.70710677, %v261_v34  ;;  %v269_v39 = vadd.f32 %v268_v37, %v158_v19  ;;  %v276_v61 = vmul.f32 0.5, %v261_v34 }
 0x210   :  { %421 = verf.f32 %v285_v35  ;;  %v286_v40 = vmul.f32 0.70710677, %v267_v36  ;;  %v270_v41 = vpop.f32.mrf.mxu1  ;;  %v278_v1 = vmul.f32 0.5, %v267_v36 }
 0x211   :  { %423 = verf.f32 %v284_v38  ;;  %v287_v42 = vmul.f32 0.70710677, %v269_v39  ;;  %v271_v43 = vadd.f32 %v270_v41, %v162_v20  ;;  %v279_v10 = vmul.f32 0.5, %v269_v39 }
 0x212   :  { %425 = verf.f32 %v286_v40 }
 0x213   :  { %427 = verf.f32 %v287_v42  ;;  %v288_v44 = vmul.f32 0.70710677, %v271_v43  ;;  %v280_v11 = vmul.f32 0.5, %v271_v43 }
 0x215   :  { %429 = verf.f32 %v288_v44 }
 0x218   :  { %v416_v45 = vpop.eup %415 }
 0x219   :  { %v297_v46 = vadd.f32 1.0, %v416_v45 }
 0x21a   :  { %v418_v47 = vpop.eup %417 }
 0x21b   :  { %v298_v50 = vadd.f32 1.0, %v418_v47  ;;  %v305_v53 = vmul.f32 %v297_v46, %v273_v48 }
 0x21c   :  { %v420_v51 = vpop.eup %419 }
 0x21d   :  { %v422_v52 = vpop.eup %421  ;;  %v306_v54 = vmul.f32 %v298_v50, %v274_v49  ;;  %v299_v55 = vadd.f32 1.0, %v420_v51 }
 0x21e   :  { %v424_v56 = vpop.eup %423  ;;  %v301_v57 = vadd.f32 1.0, %v422_v52 }
 0x21f   :  { %v426_v58 = vpop.eup %425  ;;  %v371_v59 = vpack.c.bf16 %v306_v54, %v305_v53  ;;  %v300_v62 = vadd.f32 1.0, %v424_v56  ;;  %v307_v3 = vmul.f32 %v299_v55, %v275_v60 }
 0x220   :  { %v428_v63 = vpop.eup %427  ;;  %v302_v2 = vadd.f32 1.0, %v426_v58  ;;  %v309_v7 = vmul.f32 %v301_v57, %v277_v0 }
 0x221   :  { %337 = vst [vmem:[%s552_s5] sm:$0xff] %v371_v59  ;;  %v308_v4 = vmul.f32 %v300_v62, %v276_v61  ;;  %v303_v5 = vadd.f32 1.0, %v428_v63 }
 0x222   :  { %v430_v6 = vpop.eup %429  ;;  %v310_v8 = vmul.f32 %v302_v2, %v278_v1 }
 0x223   :  { %v372_v9 = vpack.c.bf16 %v308_v4, %v307_v3  ;;  %v304_v12 = vadd.f32 1.0, %v430_v6  ;;  %v311_v14 = vmul.f32 %v303_v5, %v279_v10 }
 0x224   :  { %v373_v13 = vpack.c.bf16 %v310_v8, %v309_v7 }
 0x225   :  { %338 = vst [vmem:[%s552_s5 + $0x8] sm:$0xff] %v372_v9  ;;  %v312_v15 = vmul.f32 %v304_v12, %v280_v11 }
 0x226   :  { %339 = vst [vmem:[%s552_s5 + $0x10] sm:$0xff] %v373_v13 }
 0x227   :  { %v374_v16 = vpack.c.bf16 %v312_v15, %v311_v14 }
 0x229   :  { %340 = vst [vmem:[%s552_s5 + $0x18] sm:$0xff] %v374_v16 }

// kernel: forward.21
= control target key start
LH: loop header
LB: loop body
LE: loop exit
PB: predicated region body
PF: predicated region fallthrough
CT: control target
= control target key end

     0   :  { %vm31_vm0 = vcmask 523264   ;;  %s491_s0 = inlined_call_operand.vmem [shape: bf16[32,64], index: 0, kind: input, shape index: {}]   ;;  %s492_s1 = inlined_call_operand.vmem [shape: f32[1,64], index: 1, kind: input, shape index: {}]   ;;  %s493_s2 = inlined_call_operand.vmem [shape: f32[1,64], index: 2, kind: input, shape index: {}]   ;;  %s494_s3 = inlined_call_operand.vmem [shape: bf16[64,256], index: 3, kind: input, shape index: {}]   ;;  %s495_s4 = inlined_call_operand.hbm [shape: bf16[32,256], index: 4, kind: output, shape index: {}]  }
   0x1   :  { %v325_v0 = vld [vmem:[%s491_s0] sm:$0xff]   ;;  %v332_v1 = vld [vmem:[%s491_s0 + $0x8] sm:$0xff]  }
   0x2   :  { %v326_v2 = vunpack.c.l.bf16 %v325_v0  ;;  %v330_v3 = vunpack.c.l.bf16 %v332_v1  ;;  %v327_v4 = vunpack.c.h.bf16 %v325_v0  ;;  %v331_v5 = vunpack.c.h.bf16 %v332_v1 }
   0x4   :  { %v32_v6 = vsel %vm31_vm0, %v326_v2, 0.0  ;;  %v38_v7 = vsel %vm31_vm0, %v330_v3, 0.0 }
   0x5   :  { %33 = vadd.xlane.f32.xlu0 %v32_v6  ;;  %39 = vadd.xlane.f32.xlu1 %v38_v7 }
   0x6   :  { %9 = vsyncpa [#allocation4], 0  ;;  %v35_v8 = vsel %vm31_vm0, %v327_v4, 0.0  ;;  %v41_v9 = vsel %vm31_vm0, %v331_v5, 0.0  ;;  %v345_v30 = vld [vmem:[%s494_s3 + $0x34] ss:$8 sps:$4 sm:$0xff]  }
   0x7   :  { %v347_v31 = vld [vmem:[%s494_s3 + $0x30] ss:$8 sps:$4 sm:$0xff]   ;;  %205 = vmatprep.subr.bf16.mxu0 %v345_v30  ;;  %333 = vmatprep.subr.bf16.mxu1 %v345_v30  ;;  %v348_v32 = vld [vmem:[%s494_s3 + $0x24] ss:$8 sps:$4 sm:$0xff]   ;;  %v350_v33 = vld [vmem:[%s494_s3 + $0x20] ss:$8 sps:$4 sm:$0xff]  }
   0x8   :  { %206 = vmatpush1.bf16.msra.mxu0 %v347_v31  ;;  %337 = vmatpush1.bf16.msra.mxu1 %v347_v31  ;;  %v351_v34 = vld [vmem:[%s494_s3 + $0x14] ss:$8 sps:$4 sm:$0xff]   ;;  %v353_v35 = vld [vmem:[%s494_s3 + $0x10] ss:$8 sps:$4 sm:$0xff]   ;;  %v354_v36 = vld [vmem:[%s494_s3 + $0x4] ss:$8 sps:$4 sm:$0xff]  }
   0x9   :  { %36 = vadd.xlane.f32.xlu0 %v35_v8  ;;  %42 = vadd.xlane.f32.xlu1 %v41_v9  ;;  %v356_v37 = vld [vmem:[%s494_s3] ss:$8 sps:$4 sm:$0xff]   ;;  %v389_v38 = vmov 0   ;;  %vm123_vm1 = vcmask 519168  }
   0xa   :  { %207 = vmatprep.subr.bf16.mxu0 %v348_v32  ;;  %334 = vmatprep.subr.bf16.mxu1 %v348_v32  ;;  %v294_v52 = vld [vmem:[%s492_s1] ss:$0 sm:$0xff]  ;;  %s390_s1 = smov [#allocation3]  }
   0xb   :  { %229 = vmatprep.mubr.bf16.mxu0 %v389_v38  ;;  %239 = vmatprep.mubr.bf16.mxu1 %v389_v38  ;;  %v295_v54 = vld [vmem:[%s493_s2] ss:$0 sm:$0xff]  ;;  %s283_s2 = sshll.u32 %s390_s1, 4  ;;  %s284_s2 = int_to_ptr.vmem [resolvable:$true] %s283_s2 }
   0xc   :  { %208 = vmatpush1.bf16.msra.mxu0 %v350_v33  ;;  %338 = vmatpush1.bf16.msra.mxu1 %v350_v33  ;;  %s367_s11 = scalar_lea.vmem %s284_s2, 512  ;;  %p372_p1 = scmp.lt.s32.totalorder %s284_s2, %s284_s2 }
   0xd   :  { %209 = vmatprep.subr.bf16.mxu0 %v351_v34  ;;  %335 = vmatprep.subr.bf16.mxu1 %v351_v34  ;;  %p368_p0 = scmp.ne.s32.totalorder %s284_s2, %s367_s11  ;;  %p373_p2 = scmp.lt.s32.totalorder %s367_s11, %s367_s11 }
   0xf   :  { %p374_p3 = por %p373_p2, %p372_p1 }
  0x10   :  { %210 = vmatpush1.bf16.msra.mxu0 %v353_v35  ;;  %339 = vmatpush1.bf16.msra.mxu1 %v353_v35 }
  0x11   :  { %211 = vmatprep.subr.bf16.mxu0 %v354_v36  ;;  %336 = vmatprep.subr.bf16.mxu1 %v354_v36  ;;  %p375_p4 = pnand %p374_p3, %p368_p0 }
  0x14   :  { %212 = vmatpush1.bf16.msra.mxu0 %v356_v37  ;;  %340 = vmatpush1.bf16.msra.mxu1 %v356_v37 }
  0x8e   :  { %v34_v10 = vpop.xlane.xlu0 %33  ;;  %v40_v11 = vpop.xlane.xlu1 %39 }
  0x8f   :  { %v45_v12 = vmul.f32 0.015625, %v34_v10  ;;  %v47_v13 = vmul.f32 0.015625, %v40_v11 }
  0x91   :  { %v428_v14 = vsub.f32 %v326_v2, %v45_v12  ;;  %v430_v15 = vsub.f32 %v330_v3, %v47_v13 }
  0x92   :  { %v37_v16 = vpop.xlane.xlu0 %36  ;;  %v43_v17 = vpop.xlane.xlu1 %42 }
  0x93   :  { %v46_v18 = vmul.f32 0.015625, %v37_v16  ;;  %v48_v19 = vmul.f32 0.015625, %v43_v17  ;;  %v53_v20 = vmul.f32 %v428_v14, %v428_v14  ;;  %v55_v21 = vmul.f32 %v430_v15, %v430_v15 }
  0x95   :  { %v436_v22 = vsub.f32 %v327_v4, %v46_v18  ;;  %v438_v23 = vsub.f32 %v331_v5, %v48_v19  ;;  %v57_v24 = vsel %vm31_vm0, %v53_v20, 0.0  ;;  %v63_v25 = vsel %vm31_vm0, %v55_v21, 0.0 }
  0x96   :  { %58 = vadd.xlane.f32.xlu0 %v57_v24 }
  0x97   :  { %v54_v26 = vmul.f32 %v436_v22, %v436_v22  ;;  %v56_v27 = vmul.f32 %v438_v23, %v438_v23 }
  0x99   :  { %v60_v28 = vsel %vm31_vm0, %v54_v26, 0.0  ;;  %v66_v29 = vsel %vm31_vm0, %v56_v27, 0.0 }
  0x9a   :  { %64 = vadd.xlane.f32.xlu0 %v63_v25  ;;  %61 = vadd.xlane.f32.xlu1 %v60_v28 }
  0x9e   :  { %67 = vadd.xlane.f32.xlu1 %v66_v29 }
 0x11f   :  { %v59_v39 = vpop.xlane.xlu0 %58 }
 0x120   :  { %v69_v40 = vmul.f32 0.015625, %v59_v39 }
 0x122   :  { %v73_v41 = vadd.f32 1e-05, %v69_v40 }
 0x123   :  { %v62_v42 = vpop.xlane.xlu1 %61  ;;  %v65_v43 = vpop.xlane.xlu0 %64 }
 0x124   :  { %359 = vrsqrt.f32 %v73_v41  ;;  %v70_v44 = vmul.f32 0.015625, %v62_v42  ;;  %v71_v45 = vmul.f32 0.015625, %v65_v43 }
 0x126   :  { %v74_v46 = vadd.f32 1e-05, %v70_v44  ;;  %v75_v47 = vadd.f32 1e-05, %v71_v45 }
 0x127   :  { %v68_v48 = vpop.xlane.xlu1 %67 }
 0x128   :  { %361 = vrsqrt.f32 %v74_v46  ;;  %v72_v49 = vmul.f32 0.015625, %v68_v48 }
 0x129   :  { %363 = vrsqrt.f32 %v75_v47 }
 0x12a   :  { %v76_v50 = vadd.f32 1e-05, %v72_v49 }
 0x12c   :  { %365 = vrsqrt.f32 %v76_v50 }
 0x131   :  { %v360_v51 = vpop.eup %359 }
 0x132   :  { %v81_v53 = vmul.f32 %v360_v51, %v428_v14 }
 0x134   :  { %v92_v55 = vmul.f32 %v294_v52, %v81_v53 }
 0x135   :  { %v362_v56 = vpop.eup %361 }
 0x136   :  { %v364_v57 = vpop.eup %363  ;;  %v103_v58 = vadd.f32 %v295_v54, %v92_v55  ;;  %v82_v59 = vmul.f32 %v362_v56, %v436_v22 }
 0x137   :  { %v83_v60 = vmul.f32 %v364_v57, %v430_v15 }
 0x138   :  { %v316_v61 = vpack.c.bf16 %v103_v58, %v103_v58  ;;  %v93_v62 = vmul.f32 %v294_v52, %v82_v59 }
 0x139   :  { %v366_v63 = vpop.eup %365  ;;  %v94_v0 = vmul.f32 %v294_v52, %v83_v60 }
 0x13a   :  { %124 = vst.msk [vmem:[#allocation2] sm:$0xf] %vm123_vm1, %v316_v61  ;;  %v104_v1 = vadd.f32 %v295_v54, %v93_v62  ;;  %v84_v2 = vmul.f32 %v366_v63, %v438_v23 }
 0x13b   :  { %v105_v3 = vadd.f32 %v295_v54, %v94_v0 }
 0x13c   :  { %v317_v4 = vpack.c.bf16 %v104_v1, %v104_v1  ;;  %v95_v5 = vmul.f32 %v294_v52, %v84_v2 }
 0x13d   :  { %v318_v6 = vpack.c.bf16 %v105_v3, %v105_v3 }
 0x13e   :  { %125 = vst.msk [vmem:[#allocation2 + $0x4] sm:$0xf] %vm123_vm1, %v317_v4  ;;  %v106_v7 = vadd.f32 %v295_v54, %v95_v5 }
 0x13f   :  { %126 = vst.msk [vmem:[#allocation2 + $0x8] sm:$0xf] %vm123_vm1, %v318_v6 }
 0x140   :  { %v319_v8 = vpack.c.bf16 %v106_v7, %v106_v7 }
 0x142   :  { %127 = vst.msk [vmem:[#allocation2 + $0xc] sm:$0xf] %vm123_vm1, %v319_v8 }
 0x145   :  { %v357_v9 = vld [vmem:[#allocation2] sm:$0xff]  }
 0x146   :  { %310 = vmatmul.mubr.msk.bf16.vlgmr.msra.gmra.mxu0 %vm31_vm0, %v357_v9 }
 0x149   :  { %v358_v10 = vld [vmem:[#allocation2 + $0x8] sm:$0xff]  }
 0x14a   :  { %311 = vmatmul.mubr.msk.bf16.vlgmr.msra.gmra.mxu1 %vm31_vm0, %v358_v10 }
 0x206   :  { %v231_v11 = vpop.f32.mrf.mxu0 }
 0x208   :  { %v233_v12 = vpop.f32.mrf.mxu0 }
 0x209   :  { %v320_v13 = vpack.c.bf16 %v233_v12, %v231_v11 }
 0x20a   :  { %v235_v14 = vpop.f32.mrf.mxu0  ;;  %v241_v15 = vpop.f32.mrf.mxu1 }
 0x20b   :  { %274 = vst [vmem:[#allocation3] sm:$0xff] %v320_v13 }
 0x20c   :  { %v237_v16 = vpop.f32.mrf.mxu0  ;;  %v243_v17 = vpop.f32.mrf.mxu1 }
 0x20d   :  { %v321_v18 = vpack.c.bf16 %v237_v16, %v235_v14  ;;  %v322_v19 = vpack.c.bf16 %v243_v17, %v241_v15 }
 0x20e   :  { %v245_v20 = vpop.f32.mrf.mxu1 }
 0x20f   :  { %275 = vst [vmem:[#allocation3 + $0x8] sm:$0xff] %v321_v18  ;;  %276 = vst [vmem:[#allocation3 + $0x10] sm:$0xff] %v322_v19 }
 0x210   :  { %v247_v21 = vpop.f32.mrf.mxu1 }
 0x211   :  { %v323_v22 = vpack.c.bf16 %v247_v21, %v245_v20 }
 0x213   :  { %277 = vst [vmem:[#allocation3 + $0x18] sm:$0xff] %v323_v22 }
 0x214   :  { %378 = shalt.err (!%p375_p4)
}
 0x215   :  { %s391_s12 = smov 128   ;;  %s392_s13 = smov 8  }
 0x216   :  { %289 = dma.vmem_to_hbm [thread:$0]  %s284_s2, 512, %s495_s4, [#allocation4], %s391_s12, %s391_s12, %s392_s13  }
 0x217   :  { %387 = dma.done.wait [#allocation4], 512  }
 0x218   :  { %388 = vsyncadd [#allocation4], 4294966784 }
 0x219   :  { %293 = vsyncpa [#allocation4], 1 }

// kernel: forward.15
= control target key start
LH: loop header
LB: loop body
LE: loop exit
PB: predicated region body
PF: predicated region fallthrough
CT: control target
= control target key end

     0   :  { %vm22_vm0 = vcmask 523264   ;;  %v399_v20 = vmov 0.0   ;;  %v250_v21 = vlaneseq  ;;  %vm286_vm1 = vcmask 519168   ;;  %s514_s1 = inlined_call_operand.vmem [shape: bf16[256,64], index: 1, kind: input, shape index: {}]   ;;  %s515_s0 = inlined_call_operand.vmem [shape: bf16[32,256], index: 0, kind: input, shape index: {}]   ;;  %s516_s2 = inlined_call_operand.vmem [shape: bf16[1,64], index: 2, kind: input, shape index: {}]   ;;  %s517_s3 = inlined_call_operand.vmem [shape: bf16[32,64], index: 3, kind: input, shape index: {}]   ;;  %s518_s4 = inlined_call_operand.vmem [shape: bf16[32,64], index: 4, kind: output, shape index: {}]  }
   0x1   :  { %v377_v0 = vld [vmem:[%s514_s1 + $0x78] sm:$0xff]   ;;  %v379_v2 = vld [vmem:[%s514_s1 + $0x70] sm:$0xff]   ;;  %v381_v4 = vld [vmem:[%s514_s1 + $0x68] sm:$0xff]   ;;  %23 = vst.msk [vmem:[#allocation2] sm:$0xff] %vm22_vm0, %v399_v20 }
   0x2   :  { %v378_v1 = vld [vmem:[%s514_s1 + $0x38] sm:$0xff]   ;;  %332 = vmatprep.subr.bf16.mxu0 %v377_v0  ;;  %360 = vmatprep.subr.bf16.mxu1 %v377_v0  ;;  %v380_v3 = vld [vmem:[%s514_s1 + $0x30] sm:$0xff]   ;;  %v382_v5 = vld [vmem:[%s514_s1 + $0x28] sm:$0xff]   ;;  %24 = vst.msk [vmem:[#allocation2 + $0x8] sm:$0xff] %vm22_vm0, %v399_v20  ;;  %v251_v29 = vshrl.u32 %v250_v21, 7 }
   0x3   :  { %333 = vmatpush3.bf16.msra.mxu0 %v378_v1  ;;  %368 = vmatpush3.bf16.msra.mxu1 %v378_v1  ;;  %v383_v6 = vld [vmem:[%s514_s1 + $0x60] sm:$0xff]   ;;  %v385_v8 = vld [vmem:[%s514_s1 + $0x58] sm:$0xff]   ;;  %v387_v10 = vld [vmem:[%s514_s1 + $0x50] sm:$0xff]   ;;  %25 = vst.msk [vmem:[#allocation2 + $0x10] sm:$0xff] %vm22_vm0, %v399_v20 }
   0x4   :  { %334 = vmatprep.subr.bf16.mxu0 %v379_v2  ;;  %361 = vmatprep.subr.bf16.mxu1 %v379_v2  ;;  %v384_v7 = vld [vmem:[%s514_s1 + $0x20] sm:$0xff]   ;;  %v386_v9 = vld [vmem:[%s514_s1 + $0x18] sm:$0xff]   ;;  %v388_v13 = vld [vmem:[%s514_s1 + $0x10] sm:$0xff]   ;;  %26 = vst.msk [vmem:[#allocation2 + $0x18] sm:$0xff] %vm22_vm0, %v399_v20  ;;  %v252_v41 = vsub.s32 0, %v251_v29 }
   0x5   :  { %v395_v11 = vld [vmem:[%s515_s0 + $0x4] ss:$8 sps:$4 sm:$0xff]   ;;  %v398_v12 = vld [vmem:[%s515_s0 + $0x14] ss:$8 sps:$4 sm:$0xff]   ;;  %v393_v18 = vld [vmem:[%s515_s0] ss:$8 sps:$4 sm:$0xff]  }
   0x6   :  { %v389_v14 = vld [vmem:[%s514_s1 + $0x48] sm:$0xff]   ;;  %215 = vmatprep.mubr.bf16.mxu0 %v395_v11  ;;  %223 = vmatprep.mubr.bf16.mxu1 %v398_v12  ;;  %v391_v16 = vld [vmem:[%s514_s1 + $0x40] sm:$0xff]   ;;  %v396_v19 = vld [vmem:[%s515_s0 + $0x10] ss:$8 sps:$4 sm:$0xff]  }
   0x7   :  { %335 = vmatpush3.bf16.msra.mxu0 %v380_v3  ;;  %369 = vmatpush3.bf16.msra.mxu1 %v380_v3  ;;  %v390_v15 = vld [vmem:[%s514_s1 + $0x8] sm:$0xff]   ;;  %v392_v17 = vld [vmem:[%s514_s1] sm:$0xff]  }
   0x8   :  { %336 = vmatprep.subr.bf16.mxu0 %v381_v4  ;;  %362 = vmatprep.subr.bf16.mxu1 %v381_v4  ;;  %v27_v24 = vld [vmem:[#allocation2] sm:$0xff]  ;;  %v331_v47 = vld [vmem:[%s517_s3 + $0x8] sm:$0xff]  }
   0x9   :  { %v248_v31 = vld [vmem:[%s516_s2] sm:$0x1]  ;;  %v28_v36 = vld [vmem:[#allocation2 + $0x8] sm:$0xff]  ;;  %v329_v50 = vunpack.c.l.bf16 %v331_v47  ;;  %v330_v58 = vunpack.c.h.bf16 %v331_v47 }
   0xa   :  { %v29_v26 = vld [vmem:[#allocation2 + $0x10] sm:$0xff]  ;;  %v249_v40 = vunpack.c.l.bf16 %v248_v31  ;;  %v324_v46 = vld [vmem:[%s517_s3] sm:$0xff]  }
   0xb   :  { %337 = vmatpush3.bf16.msra.mxu0 %v382_v5  ;;  %370 = vmatpush3.bf16.msra.mxu1 %v382_v5  ;;  %v30_v38 = vld [vmem:[#allocation2 + $0x18] sm:$0xff]  ;;  %v325_v49 = vunpack.c.l.bf16 %v324_v46  ;;  %v326_v57 = vunpack.c.h.bf16 %v324_v46 }
   0xc   :  { %338 = vmatprep.subr.bf16.mxu0 %v383_v6  ;;  %363 = vmatprep.subr.bf16.mxu1 %v383_v6  ;;  %v253_v48 = vrot.slane %v249_v40, %v252_v41 }
   0xf   :  { %339 = vmatpush3.bf16.msra.mxu0 %v384_v7  ;;  %371 = vmatpush3.bf16.msra.mxu1 %v384_v7 }
  0x10   :  { %340 = vmatprep.subr.bf16.mxu0 %v385_v8  ;;  %364 = vmatprep.subr.bf16.mxu1 %v385_v8 }
  0x13   :  { %341 = vmatpush3.bf16.msra.mxu0 %v386_v9  ;;  %372 = vmatpush3.bf16.msra.mxu1 %v386_v9 }
  0x14   :  { %342 = vmatprep.subr.bf16.mxu0 %v387_v10  ;;  %365 = vmatprep.subr.bf16.mxu1 %v387_v10 }
  0x17   :  { %343 = vmatpush3.bf16.msra.mxu0 %v388_v13  ;;  %373 = vmatpush3.bf16.msra.mxu1 %v388_v13 }
  0x18   :  { %344 = vmatprep.subr.bf16.mxu0 %v389_v14  ;;  %366 = vmatprep.subr.bf16.mxu1 %v389_v14 }
  0x1b   :  { %345 = vmatpush3.bf16.msra.mxu0 %v390_v15  ;;  %374 = vmatpush3.bf16.msra.mxu1 %v390_v15 }
  0x1c   :  { %346 = vmatprep.subr.bf16.mxu0 %v391_v16  ;;  %367 = vmatprep.subr.bf16.mxu1 %v391_v16 }
  0x1f   :  { %347 = vmatpush3.bf16.msra.mxu0 %v392_v17  ;;  %375 = vmatpush3.bf16.msra.mxu1 %v392_v17 }
  0x22   :  { %216 = vmatmul.mubr.bf16.vlgmr.msra.gmra.mxu0 %v393_v18  ;;  %224 = vmatmul.mubr.bf16.vlgmr.msra.gmra.mxu1 %v396_v19 }
  0xe2   :  { %v348_v22 = vpop.f32.mrf.mxu0  ;;  %v354_v23 = vpop.f32.mrf.mxu1 }
  0xe4   :  { %v349_v25 = vpop.f32.mrf.mxu0  ;;  %v355_v27 = vpop.f32.mrf.mxu1 }
  0xe5   :  { %v350_v28 = vadd.f32 %v349_v25, %v348_v22  ;;  %v356_v30 = vadd.f32 %v355_v27, %v354_v23 }
  0xe6   :  { %v351_v32 = vpop.f32.mrf.mxu0  ;;  %v357_v33 = vpop.f32.mrf.mxu1 }
  0xe7   :  { %v232_v34 = vadd.f32 %v350_v28, %v27_v24  ;;  %v234_v35 = vadd.f32 %v356_v30, %v29_v26 }
  0xe8   :  { %v352_v37 = vpop.f32.mrf.mxu0  ;;  %v358_v39 = vpop.f32.mrf.mxu1 }
  0xe9   :  { %237 = vst.msk [vmem:[#allocation2] sm:$0xff] %vm22_vm0, %v232_v34  ;;  %239 = vst.msk [vmem:[#allocation2 + $0x10] sm:$0xff] %vm22_vm0, %v234_v35  ;;  %v353_v42 = vadd.f32 %v352_v37, %v351_v32  ;;  %v359_v43 = vadd.f32 %v358_v39, %v357_v33 }
  0xeb   :  { %v233_v44 = vadd.f32 %v353_v42, %v28_v36  ;;  %v235_v45 = vadd.f32 %v359_v43, %v30_v38 }
  0xed   :  { %238 = vst.msk [vmem:[#allocation2 + $0x8] sm:$0xff] %vm22_vm0, %v233_v44  ;;  %240 = vst.msk [vmem:[#allocation2 + $0x18] sm:$0xff] %vm22_vm0, %v235_v45 }
  0xf0   :  { %v244_v51 = vld [vmem:[#allocation2] sm:$0xff]  ;;  %v246_v52 = vld [vmem:[#allocation2 + $0x10] sm:$0xff] }
  0xf1   :  { %v254_v53 = vadd.f32 %v253_v48, %v244_v51  ;;  %v256_v54 = vadd.f32 %v253_v48, %v246_v52 }
  0xf3   :  { %v266_v55 = vadd.f32 %v325_v49, %v254_v53  ;;  %v268_v56 = vadd.f32 %v329_v50, %v256_v54 }
  0xf4   :  { %v245_v59 = vld [vmem:[#allocation2 + $0x8] sm:$0xff]  ;;  %v247_v60 = vld [vmem:[#allocation2 + $0x18] sm:$0xff] }
  0xf5   :  { %v319_v61 = vpack.c.bf16 %v266_v55, %v266_v55  ;;  %v321_v62 = vpack.c.bf16 %v268_v56, %v268_v56  ;;  %v255_v63 = vadd.f32 %v253_v48, %v245_v59  ;;  %v257_v0 = vadd.f32 %v253_v48, %v247_v60 }
  0xf7   :  { %287 = vst.msk [vmem:[%s518_s4] sm:$0xf] %vm286_vm1, %v319_v61  ;;  %289 = vst.msk [vmem:[%s518_s4 + $0x8] sm:$0xf] %vm286_vm1, %v321_v62  ;;  %v267_v1 = vadd.f32 %v326_v57, %v255_v63  ;;  %v269_v2 = vadd.f32 %v330_v58, %v257_v0 }
  0xf9   :  { %v320_v3 = vpack.c.bf16 %v267_v1, %v267_v1  ;;  %v322_v4 = vpack.c.bf16 %v269_v2, %v269_v2 }
  0xfb   :  { %288 = vst.msk [vmem:[%s518_s4 + $0x4] sm:$0xf] %vm286_vm1, %v320_v3  ;;  %290 = vst.msk [vmem:[%s518_s4 + $0xc] sm:$0xf] %vm286_vm1, %v322_v4 }

</bundles_post_ra>
